<compile_context>
chip_gen: v6e
topology: v6e:2x2x1
jax: 0.10.0
libtpu: 0.0.40
codegen_flags: <defaults>
</compile_context>

<pallas_src>
import jax
import jax.numpy as jnp
from jax import lax
from jax.experimental import pallas as pl
from jax.experimental.pallas import tpu as pltpu

B, T = 2, 8                 # batch, clip_len
CIN, H, W = 4, 16, 16       # per-frame channels / spatial
CH = 16                     # backbone conv channels
F = 32                      # per-frame feature dim
HID = 32                    # temporal hidden dim
NUM_CLASSES = 8
THW = T * H * W             # rows of the per-clip im2col slab
KC = 9 * CIN                # im2col contraction width


# ----------------------------- Pallas kernel -------------------------------

def _fused_kernel(patches_ref, pool_ref, wc_ref, bc_ref, wp_ref, bp_ref,
                  wt_ref, b1_ref, w2_ref, b2_ref, out_ref):
    # patches_ref: (1, T*H*W, 9*CIN) im2col slab for one clip
    # pool_ref:    (T, T*H*W)        block-averaging matrix (1/(H*W) entries)
    # wc_ref: (9*CIN, CH)  bc_ref: (1, CH)
    # wp_ref: (CH, F)      bp_ref: (1, F)
    # wt_ref: (3, F, HID)  b1_ref: (1, HID)
    # w2_ref: (HID, NUM_CLASSES)  b2_ref: (1, NUM_CLASSES)
    # out_ref: (1, T, NUM_CLASSES)
    patches = patches_ref[0]                                          # (THW, 9*CIN)

    # --- backbone: conv3x3 (im2col, single MXU push) + bias + ReLU ---
    y = jnp.dot(patches, wc_ref[...], preferred_element_type=jnp.float32)
    y = jnp.maximum(y + bc_ref[...], 0.0)                             # (THW, CH)

    # --- global average pool per frame (as an MXU matmul) + FC projection ---
    pooled = jnp.dot(pool_ref[...], y, preferred_element_type=jnp.float32)   # (T, CH)
    feat = jnp.dot(pooled, wp_ref[...],
                   preferred_element_type=jnp.float32) + bp_ref[...]         # (T, F)

    # --- temporal head: 3-tap conv1d (SAME, zero pad) + ReLU + Linear ---
    zero = jnp.zeros((1, F), jnp.float32)
    fp = jnp.concatenate([zero, feat, zero], axis=0)                  # (T+2, F)
    wt = wt_ref[...]                                                  # (3, F, HID)
    h = (jnp.dot(fp[0:T], wt[0], preferred_element_type=jnp.float32)
         + jnp.dot(fp[1:T + 1], wt[1], preferred_element_type=jnp.float32)
         + jnp.dot(fp[2:T + 2], wt[2], preferred_element_type=jnp.float32)
         + b1_ref[...])
    h = jnp.maximum(h, 0.0)                                           # (T, HID)
    out_ref[0] = jnp.dot(h, w2_ref[...],
                         preferred_element_type=jnp.float32) + b2_ref[...]


# ------------------------------- wrapper ------------------------------------

def init_params(key):
    ks = jax.random.split(key, 8)
    return {
        "wconv": 0.1 * jax.random.normal(ks[0], (3, 3, CIN, CH), jnp.float32),
        "bconv": 0.05 * jax.random.normal(ks[1], (1, CH), jnp.float32),
        "wproj": 0.1 * jax.random.normal(ks[2], (CH, F), jnp.float32),
        "bproj": 0.05 * jax.random.normal(ks[3], (1, F), jnp.float32),
        "wt":    0.1 * jax.random.normal(ks[4], (3, F, HID), jnp.float32),
        "b1":    0.05 * jax.random.normal(ks[5], (1, HID), jnp.float32),
        "w2":    0.1 * jax.random.normal(ks[6], (HID, NUM_CLASSES), jnp.float32),
        "b2":    0.05 * jax.random.normal(ks[7], (1, NUM_CLASSES), jnp.float32),
    }


@jax.jit
def video_label_hierarchy(x, params):
    # x: (B, T, C, H, W) float32 — PyTorch NCHW per frame.
    batch, clip_len = x.shape[0], x.shape[1]
    n = batch * clip_len

    # ---- glue: NCHW -> NHWC, SAME spatial pad, im2col patch slab ----
    x_in = x.reshape(n, CIN, H, W).transpose(0, 2, 3, 1)              # (n, H, W, CIN)
    xp = jnp.pad(x_in, ((0, 0), (1, 1), (1, 1), (0, 0)))              # (n, H+2, W+2, CIN)
    patches = jnp.concatenate(
        [xp[:, kh:kh + H, kw:kw + W, :] for kh in range(3) for kw in range(3)],
        axis=-1)                                                      # (n, H, W, 9*CIN)
    patches = patches.reshape(batch, clip_len * H * W, KC)            # (B, THW, 9*CIN)

    wconv = params["wconv"].reshape(KC, CH)                           # tap order matches patches
    # block-averaging matrix: pool[t, i] = 1/(H*W) for i in [t*H*W, (t+1)*H*W)
    pool = jnp.repeat(jnp.eye(clip_len, dtype=jnp.float32),
                      H * W, axis=1) / float(H * W)                   # (T, THW)

    logits = pl.pallas_call(
        _fused_kernel,
        out_shape=jax.ShapeDtypeStruct((batch, clip_len, NUM_CLASSES), jnp.float32),
        grid=(batch,),
        in_specs=[
            pl.BlockSpec((1, THW, KC), lambda b: (b, 0, 0)),          # per-clip patches
            pl.BlockSpec((T, THW), lambda b: (0, 0)),                 # pool matrix (resident)
            pl.BlockSpec((KC, CH), lambda b: (0, 0)),                 # conv weight
            pl.BlockSpec((1, CH), lambda b: (0, 0)),
            pl.BlockSpec((CH, F), lambda b: (0, 0)),
            pl.BlockSpec((1, F), lambda b: (0, 0)),
            pl.BlockSpec((3, F, HID), lambda b: (0, 0, 0)),
            pl.BlockSpec((1, HID), lambda b: (0, 0)),
            pl.BlockSpec((HID, NUM_CLASSES), lambda b: (0, 0)),
            pl.BlockSpec((1, NUM_CLASSES), lambda b: (0, 0)),
        ],
        out_specs=pl.BlockSpec((1, clip_len, NUM_CLASSES), lambda b: (b, 0, 0)),
        compiler_params=pltpu.CompilerParams(dimension_semantics=("parallel",)),
    )(patches, pool, wconv, params["bconv"], params["wproj"], params["bproj"],
      params["wt"], params["b1"], params["w2"], params["b2"])
    return logits


# ----------------------------- plain-JAX reference --------------------------

def reference(x, params):
    batch, clip_len = x.shape[0], x.shape[1]
    n = batch * clip_len
    x_in = x.reshape(n, CIN, H, W).transpose(0, 2, 3, 1)
    conv = lax.conv_general_dilated(
        x_in, params["wconv"], window_strides=(1, 1), padding="SAME",
        dimension_numbers=("NHWC", "HWIO", "NHWC"))
    y = jnp.maximum(conv + params["bconv"].reshape(1, 1, 1, CH), 0.0)
    pooled = y.mean(axis=(1, 2))
    feat = pooled @ params["wproj"] + params["bproj"]
    f = feat.reshape(batch, clip_len, F)
    fprev = jnp.pad(f, ((0, 0), (1, 0), (0, 0)))[:, :clip_len]
    fnext = jnp.pad(f, ((0, 0), (0, 1), (0, 0)))[:, 1:]
    h = jnp.maximum(fprev @ params["wt"][0] + f @ params["wt"][1]
                    + fnext @ params["wt"][2] + params["b1"], 0.0)
    return h @ params["w2"] + params["b2"]


if __name__ == "__main__":
    key = jax.random.PRNGKey(0)
    kx, kp = jax.random.split(key)
    x = jax.random.normal(kx, (B, T, CIN, H, W), jnp.float32)
    params = init_params(kp)

    out = video_label_hierarchy(x, params)
    out = jax.block_until_ready(out)
    assert out.shape == (B, T, NUM_CLASSES)

    ref = reference(x, params)
    max_err = float(jnp.max(jnp.abs(out - ref)))
    assert jnp.allclose(out, ref, atol=1e-4, rtol=1e-4), f"max_err={max_err}"
    print("KERNEL_OK")
</pallas_src>

<mosaic_0001>
module attributes {stable_mosaic.version = 11 : i64} {
  func.func @_fused_kernel(%arg0: i32, %arg1: memref<1x2048x36xf32, #tpu.memory_space<vmem>>, %arg2: memref<8x2048xf32, #tpu.memory_space<vmem>>, %arg3: memref<36x16xf32, #tpu.memory_space<vmem>>, %arg4: memref<1x16xf32, #tpu.memory_space<vmem>>, %arg5: memref<16x32xf32, #tpu.memory_space<vmem>>, %arg6: memref<1x32xf32, #tpu.memory_space<vmem>>, %arg7: memref<3x32x32xf32, #tpu.memory_space<vmem>>, %arg8: memref<1x32xf32, #tpu.memory_space<vmem>>, %arg9: memref<32x8xf32, #tpu.memory_space<vmem>>, %arg10: memref<1x8xf32, #tpu.memory_space<vmem>>, %arg11: memref<1x8x8xf32, #tpu.memory_space<vmem>>) attributes {dimension_semantics = [#tpu.dimension_semantics<parallel>], iteration_bounds = array<i64: 2>, scalar_prefetch = 0 : i64, scratch_operands = 0 : i64, tpu.core_type = #tpu.core_type<tc>, window_params = [{transform_indices = @transform_0, window_bounds = array<i64: 1, 2048, 36>}, {pipeline_mode = #tpu.pipeline_mode<synchronous>, transform_indices = @transform_1, window_bounds = array<i64: 8, 2048>}, {pipeline_mode = #tpu.pipeline_mode<synchronous>, transform_indices = @transform_2, window_bounds = array<i64: 36, 16>}, {pipeline_mode = #tpu.pipeline_mode<synchronous>, transform_indices = @transform_3, window_bounds = array<i64: 1, 16>}, {pipeline_mode = #tpu.pipeline_mode<synchronous>, transform_indices = @transform_4, window_bounds = array<i64: 16, 32>}, {pipeline_mode = #tpu.pipeline_mode<synchronous>, transform_indices = @transform_5, window_bounds = array<i64: 1, 32>}, {pipeline_mode = #tpu.pipeline_mode<synchronous>, transform_indices = @transform_6, window_bounds = array<i64: 3, 32, 32>}, {pipeline_mode = #tpu.pipeline_mode<synchronous>, transform_indices = @transform_7, window_bounds = array<i64: 1, 32>}, {pipeline_mode = #tpu.pipeline_mode<synchronous>, transform_indices = @transform_8, window_bounds = array<i64: 32, 8>}, {pipeline_mode = #tpu.pipeline_mode<synchronous>, transform_indices = @transform_9, window_bounds = array<i64: 1, 8>}, {transform_indices = @transform_10, window_bounds = array<i64: 1, 8, 8>}]} {
    %c0 = arith.constant 0 : index
    %c0_0 = arith.constant 0 : index
    %c0_1 = arith.constant 0 : index
    %0 = vector.load %arg1[%c0, %c0_0, %c0_1] : memref<1x2048x36xf32, #tpu.memory_space<vmem>>, vector<1x2048x36xf32>
    %1 = vector.shape_cast %0 : vector<1x2048x36xf32> to vector<2048x36xf32>
    %c0_2 = arith.constant 0 : index
    %c0_3 = arith.constant 0 : index
    %2 = vector.load %arg3[%c0_2, %c0_3] : memref<36x16xf32, #tpu.memory_space<vmem>>, vector<36x16xf32>
    %cst = arith.constant dense<0.000000e+00> : vector<2048x16xf32>
    %3 = tpu.matmul %1, %2, %cst {dimension_numbers = #tpu.dot_dimension_numbers<[1], [0], [0], [1], [0, 0, 1, 1], [], []>} : vector<2048x36xf32>, vector<36x16xf32>, vector<2048x16xf32> -> vector<2048x16xf32>
    %c0_4 = arith.constant 0 : index
    %c0_5 = arith.constant 0 : index
    %4 = vector.load %arg4[%c0_4, %c0_5] : memref<1x16xf32, #tpu.memory_space<vmem>>, vector<1x16xf32>
    %5 = vector.broadcast %4 : vector<1x16xf32> to vector<2048x16xf32>
    %6 = arith.addf %3, %5 : vector<2048x16xf32>
    %cst_6 = arith.constant 0.000000e+00 : f32
    %7 = vector.broadcast %cst_6 : f32 to vector<2048x16xf32>
    %8 = arith.maximumf %6, %7 : vector<2048x16xf32>
    %c0_7 = arith.constant 0 : index
    %c0_8 = arith.constant 0 : index
    %9 = vector.load %arg2[%c0_7, %c0_8] : memref<8x2048xf32, #tpu.memory_space<vmem>>, vector<8x2048xf32>
    %cst_9 = arith.constant dense<0.000000e+00> : vector<8x16xf32>
    %10 = tpu.matmul %9, %8, %cst_9 {dimension_numbers = #tpu.dot_dimension_numbers<[1], [0], [0], [1], [0, 0, 1, 1], [], []>} : vector<8x2048xf32>, vector<2048x16xf32>, vector<8x16xf32> -> vector<8x16xf32>
    %c0_10 = arith.constant 0 : index
    %c0_11 = arith.constant 0 : index
    %11 = vector.load %arg5[%c0_10, %c0_11] : memref<16x32xf32, #tpu.memory_space<vmem>>, vector<16x32xf32>
    %cst_12 = arith.constant dense<0.000000e+00> : vector<8x32xf32>
    %12 = tpu.matmul %10, %11, %cst_12 {dimension_numbers = #tpu.dot_dimension_numbers<[1], [0], [0], [1], [0, 0, 1, 1], [], []>} : vector<8x16xf32>, vector<16x32xf32>, vector<8x32xf32> -> vector<8x32xf32>
    %c0_13 = arith.constant 0 : index
    %c0_14 = arith.constant 0 : index
    %13 = vector.load %arg6[%c0_13, %c0_14] : memref<1x32xf32, #tpu.memory_space<vmem>>, vector<1x32xf32>
    %14 = vector.broadcast %13 : vector<1x32xf32> to vector<8x32xf32>
    %15 = arith.addf %12, %14 : vector<8x32xf32>
    %cst_15 = arith.constant 0.000000e+00 : f32
    %16 = vector.broadcast %cst_15 : f32 to vector<1x32xf32>
    %17 = tpu.concatenate %16, %15, %16 in 0 : vector<1x32xf32>, vector<8x32xf32>, vector<1x32xf32> -> vector<10x32xf32>
    %c0_16 = arith.constant 0 : index
    %c0_17 = arith.constant 0 : index
    %c0_18 = arith.constant 0 : index
    %18 = vector.load %arg7[%c0_16, %c0_17, %c0_18] : memref<3x32x32xf32, #tpu.memory_space<vmem>>, vector<3x32x32xf32>
    %19 = vector.extract_strided_slice %17 {offsets = [0, 0], sizes = [8, 32], strides = [1, 1]} : vector<10x32xf32> to vector<8x32xf32>
    %20 = vector.extract_strided_slice %18 {offsets = [0, 0, 0], sizes = [1, 32, 32], strides = [1, 1, 1]} : vector<3x32x32xf32> to vector<1x32x32xf32>
    %21 = vector.shape_cast %20 : vector<1x32x32xf32> to vector<32x32xf32>
    %cst_19 = arith.constant dense<0.000000e+00> : vector<8x32xf32>
    %22 = tpu.matmul %19, %21, %cst_19 {dimension_numbers = #tpu.dot_dimension_numbers<[1], [0], [0], [1], [0, 0, 1, 1], [], []>} : vector<8x32xf32>, vector<32x32xf32>, vector<8x32xf32> -> vector<8x32xf32>
    %23 = vector.extract_strided_slice %17 {offsets = [1, 0], sizes = [8, 32], strides = [1, 1]} : vector<10x32xf32> to vector<8x32xf32>
    %24 = vector.extract_strided_slice %18 {offsets = [1, 0, 0], sizes = [1, 32, 32], strides = [1, 1, 1]} : vector<3x32x32xf32> to vector<1x32x32xf32>
    %25 = vector.shape_cast %24 : vector<1x32x32xf32> to vector<32x32xf32>
    %cst_20 = arith.constant dense<0.000000e+00> : vector<8x32xf32>
    %26 = tpu.matmul %23, %25, %cst_20 {dimension_numbers = #tpu.dot_dimension_numbers<[1], [0], [0], [1], [0, 0, 1, 1], [], []>} : vector<8x32xf32>, vector<32x32xf32>, vector<8x32xf32> -> vector<8x32xf32>
    %27 = arith.addf %22, %26 : vector<8x32xf32>
    %28 = vector.extract_strided_slice %17 {offsets = [2, 0], sizes = [8, 32], strides = [1, 1]} : vector<10x32xf32> to vector<8x32xf32>
    %29 = vector.extract_strided_slice %18 {offsets = [2, 0, 0], sizes = [1, 32, 32], strides = [1, 1, 1]} : vector<3x32x32xf32> to vector<1x32x32xf32>
    %30 = vector.shape_cast %29 : vector<1x32x32xf32> to vector<32x32xf32>
    %cst_21 = arith.constant dense<0.000000e+00> : vector<8x32xf32>
    %31 = tpu.matmul %28, %30, %cst_21 {dimension_numbers = #tpu.dot_dimension_numbers<[1], [0], [0], [1], [0, 0, 1, 1], [], []>} : vector<8x32xf32>, vector<32x32xf32>, vector<8x32xf32> -> vector<8x32xf32>
    %32 = arith.addf %27, %31 : vector<8x32xf32>
    %c0_22 = arith.constant 0 : index
    %c0_23 = arith.constant 0 : index
    %33 = vector.load %arg8[%c0_22, %c0_23] : memref<1x32xf32, #tpu.memory_space<vmem>>, vector<1x32xf32>
    %34 = vector.broadcast %33 : vector<1x32xf32> to vector<8x32xf32>
    %35 = arith.addf %32, %34 : vector<8x32xf32>
    %cst_24 = arith.constant 0.000000e+00 : f32
    %36 = vector.broadcast %cst_24 : f32 to vector<8x32xf32>
    %37 = arith.maximumf %35, %36 : vector<8x32xf32>
    %c0_25 = arith.constant 0 : index
    %c0_26 = arith.constant 0 : index
    %38 = vector.load %arg9[%c0_25, %c0_26] : memref<32x8xf32, #tpu.memory_space<vmem>>, vector<32x8xf32>
    %cst_27 = arith.constant dense<0.000000e+00> : vector<8x8xf32>
    %39 = tpu.matmul %37, %38, %cst_27 {dimension_numbers = #tpu.dot_dimension_numbers<[1], [0], [0], [1], [0, 0, 1, 1], [], []>} : vector<8x32xf32>, vector<32x8xf32>, vector<8x8xf32> -> vector<8x8xf32>
    %c0_28 = arith.constant 0 : index
    %c0_29 = arith.constant 0 : index
    %40 = vector.load %arg10[%c0_28, %c0_29] : memref<1x8xf32, #tpu.memory_space<vmem>>, vector<1x8xf32>
    %41 = vector.broadcast %40 : vector<1x8xf32> to vector<8x8xf32>
    %42 = arith.addf %39, %41 : vector<8x8xf32>
    %c0_30 = arith.constant 0 : index
    %c0_31 = arith.constant 0 : index
    %c0_32 = arith.constant 0 : index
    %43 = vector.load %arg11[%c0_30, %c0_31, %c0_32] : memref<1x8x8xf32, #tpu.memory_space<vmem>>, vector<1x8x8xf32>
    %44 = vector.shape_cast %43 : vector<1x8x8xf32> to vector<8x8xf32>
    %45 = vector.shape_cast %42 : vector<8x8xf32> to vector<1x8x8xf32>
    tpu.vector_store %arg11[%c0_30, %c0_31, %c0_32], %45 {strides = array<i32>} : memref<1x8x8xf32, #tpu.memory_space<vmem>>, vector<1x8x8xf32>,
    return
  }
  func.func @transform_0(%arg0: i32) -> (i32, i32, i32) {
    %c0_i32 = arith.constant 0 : i32
    %c0_i32_0 = arith.constant 0 : i32
    %c0_i32_1 = arith.constant 0 : i32
    return %arg0, %c0_i32, %c0_i32_0 : i32, i32, i32
  }
  func.func @transform_1(%arg0: i32) -> (i32, i32) {
    %c0_i32 = arith.constant 0 : i32
    %c0_i32_0 = arith.constant 0 : i32
    %c0_i32_1 = arith.constant 0 : i32
    return %c0_i32, %c0_i32_0 : i32, i32
  }
  func.func @transform_2(%arg0: i32) -> (i32, i32) {
    %c0_i32 = arith.constant 0 : i32
    %c0_i32_0 = arith.constant 0 : i32
    %c0_i32_1 = arith.constant 0 : i32
    return %c0_i32, %c0_i32_0 : i32, i32
  }
  func.func @transform_3(%arg0: i32) -> (i32, i32) {
    %c0_i32 = arith.constant 0 : i32
    %c0_i32_0 = arith.constant 0 : i32
    %c0_i32_1 = arith.constant 0 : i32
    return %c0_i32, %c0_i32_0 : i32, i32
  }
  func.func @transform_4(%arg0: i32) -> (i32, i32) {
    %c0_i32 = arith.constant 0 : i32
    %c0_i32_0 = arith.constant 0 : i32
    %c0_i32_1 = arith.constant 0 : i32
    return %c0_i32, %c0_i32_0 : i32, i32
  }
  func.func @transform_5(%arg0: i32) -> (i32, i32) {
    %c0_i32 = arith.constant 0 : i32
    %c0_i32_0 = arith.constant 0 : i32
    %c0_i32_1 = arith.constant 0 : i32
    return %c0_i32, %c0_i32_0 : i32, i32
  }
  func.func @transform_6(%arg0: i32) -> (i32, i32, i32) {
    %c0_i32 = arith.constant 0 : i32
    %c0_i32_0 = arith.constant 0 : i32
    %c0_i32_1 = arith.constant 0 : i32
    %c0_i32_2 = arith.constant 0 : i32
    return %c0_i32, %c0_i32_0, %c0_i32_1 : i32, i32, i32
  }
  func.func @transform_7(%arg0: i32) -> (i32, i32) {
    %c0_i32 = arith.constant 0 : i32
    %c0_i32_0 = arith.constant 0 : i32
    %c0_i32_1 = arith.constant 0 : i32
    return %c0_i32, %c0_i32_0 : i32, i32
  }
  func.func @transform_8(%arg0: i32) -> (i32, i32) {
    %c0_i32 = arith.constant 0 : i32
    %c0_i32_0 = arith.constant 0 : i32
    %c0_i32_1 = arith.constant 0 : i32
    return %c0_i32, %c0_i32_0 : i32, i32
  }
  func.func @transform_9(%arg0: i32) -> (i32, i32) {
    %c0_i32 = arith.constant 0 : i32
    %c0_i32_0 = arith.constant 0 : i32
    %c0_i32_1 = arith.constant 0 : i32
    return %c0_i32, %c0_i32_0 : i32, i32
  }
  func.func @transform_10(%arg0: i32) -> (i32, i32, i32) {
    %c0_i32 = arith.constant 0 : i32
    %c0_i32_0 = arith.constant 0 : i32
    %c0_i32_1 = arith.constant 0 : i32
    return %arg0, %c0_i32, %c0_i32_0 : i32, i32, i32
  }
}

</mosaic_0001>

<bundles_post_ra>
// kernel: video_label_hierarchy.1
= control target key start
LH: loop header
LB: loop body
LE: loop exit
PB: predicated region body
PF: predicated region fallthrough
CT: control target
= control target key end

     0   :  { %s7121_s0 = inlined_call_operand.vmem [shape: f32[2,2048,36], index: 0, kind: input, shape index: {}]   ;;  %s7122_s1 = inlined_call_operand.vmem [shape: f32[8,2048], index: 1, kind: input, shape index: {}]   ;;  %s7123_s2 = inlined_call_operand.vmem [shape: f32[36,16], index: 2, kind: input, shape index: {}]   ;;  %s7124_s3 = inlined_call_operand.vmem [shape: f32[1,16], index: 3, kind: input, shape index: {}]   ;;  %s7125_s4 = inlined_call_operand.vmem [shape: f32[16,32], index: 4, kind: input, shape index: {}]   ;;  %s7126_s5 = inlined_call_operand.vmem [shape: f32[1,32], index: 5, kind: input, shape index: {}]   ;;  %s7127_s6 = inlined_call_operand.vmem [shape: f32[3,32,32], index: 6, kind: input, shape index: {}]   ;;  %s7128_s7 = inlined_call_operand.vmem [shape: f32[1,32], index: 7, kind: input, shape index: {}]   ;;  %s7129_s8 = inlined_call_operand.vmem [shape: f32[32,8], index: 8, kind: input, shape index: {}]   ;;  %s7130_s9 = inlined_call_operand.vmem [shape: f32[1,8], index: 9, kind: input, shape index: {}]   ;;  %s7131_s10 = inlined_call_operand.hbm [shape: f32[2,8,8], index: 10, kind: output, shape index: {}]  }
   0x1   :  { %7132 = sst [smem:[#allocation32_spill]] %s7121_s0 }
   0x2   :  { %15 = vsyncpa [#allocation3], 0 }
   0x3   :  { %17 = vsyncpa [#allocation3 + $0x1], 0  ;;  %s5533_s13 = smov 0   ;;  %s5535_s14 = smov 0  }
   0x4   :  { %s5537_s15 = smov 0   ;;  %s5539_s16 = smov 0  }
   0x5 LB: > { %s5554_s17 = sadd.s32 4294967295, %s5473_s16   ;;  %s4073_s18 = sadd.s32 4294967294, %s5473_s16   ;;  %s5473_s16 = sphi %s5539_s16, %s7193_s16   ;;  %s5469_s15 = sphi %s5537_s15, %s7192_s15   ;;  %s5465_s14 = sphi %s5535_s14, %s7191_s14   ;;  %s5461_s13 = sphi %s5533_s13, %s7190_s13  }
   0x6   : > { %s5558_s19 = sadd.s32 1, %s5473_s16   ;;  %s245_s20 = sadd.s32 1, %s5469_s15 }
   0x7   : > { %s242_s21 = ssub.s32 %s5473_s16, %s5558_s19  ;;  %p255_p0 = scmp.ne.s32.totalorder %s5469_s15, %s5465_s14 }
   0x8   : > { %p243_p1 = scmp.eq.s32.totalorder %s242_s21, 0  ;;  %p256_p2 = scmp.eq.s32.totalorder %s5554_s17, 1 }
   0x9   : > { %p261_p3 = scmp.ne.s32.totalorder %s5465_s14, %s5461_s13  ;;  %p262_p4 = scmp.eq.s32.totalorder %s4073_s18, 1 }
   0xa   : > { %s5569_s22 = scalar_select %p243_p1, %s5469_s15, %s245_s20  }
   0xb   : > { %p5571_p5 = por %p256_p2, %p255_p0  ;;  %p5575_p6 = por %p262_p4, %p261_p3 }
   0xc   : > { %p4076_p7 = scmp.ge.s32.totalorder %s5473_s16, 1  ;;  %p315_p8 = scmp.lt.s32.totalorder %s5473_s16, 3 }
   0xe   : > { %p316_p9 = pnand %p4076_p7, %p315_p8 }
  0x10   : > { %319 = sbr.rel (%p316_p9) target bundleno = 1528 (0x5f8), region = 60 }
  0x15   : > { %v618_v0 = vld [vmem:[%s7123_s2 + $0x20] sm:$0xf]  ;;  %vm1395_vm0 = vcmask 1043456   ;;  %v617_v1 = vld [vmem:[%s7123_s2 + $0x18] sm:$0xff]  ;;  %p353_p10 = scmp.lt.s32.totalorder %s5554_s17, 1  ;;  %v616_v2 = vld [vmem:[%s7123_s2 + $0x10] sm:$0xff] }
  0x16   : > { %4915 = vmatprep.subr.msk.mxu0 %vm1395_vm0, %v618_v0  ;;  %5360 = vmatprep.subr.msk.mxu1 %vm1395_vm0, %v618_v0  ;;  %v615_v3 = vld [vmem:[%s7123_s2 + $0x8] sm:$0xff]  ;;  %vm626_vm1 = vcmask 293888   ;;  %s7135_s0 = sld [smem:[#allocation32_spill]]  ;;  %v614_v4 = vld [vmem:[%s7123_s2] sm:$0xff]  ;;  %vm5476_vm2 = vmmov 0   ;;  %vm3585_vm3 = vcmask 130048  }
  0x17   : > { %4916 = vmatpush3.msk.msra.mxu0 %vm1395_vm0, %v618_v0  ;;  %s354_s11 = scalar_select %p353_p10, %s5554_s17, 1  ;;  %5365 = vmatpush3.msk.msra.mxu1 %vm1395_vm0, %v618_v0  ;;  %vm3662_vm4 = vcmask 1040384   ;;  %vm3679_vm5 = vcmask 1046528   ;;  %vm3683_vm6 = vcmask 261120   ;;  %vm3828_vm7 = vcmask 1045504  }
  0x18   : > { %4917 = vmatprep.subr.mxu0 %v617_v1  ;;  %5361 = vmatprep.subr.mxu1 %v617_v1  ;;  %vm3998_vm8 = vcmask 64512  }
  0x19   : > { %4918 = vmatpush3.msra.mxu0 %v617_v1  ;;  %s4350_s20 = sshll.u32 %s354_s11, 11  ;;  %5366 = vmatpush3.msra.mxu1 %v617_v1 }
  0x1a   : > { %4919 = vmatprep.subr.mxu0 %v616_v2  ;;  %5362 = vmatprep.subr.mxu1 %v616_v2 }
  0x1b   : > { %4920 = vmatpush3.msra.mxu0 %v616_v2  ;;  %5367 = vmatpush3.msra.mxu1 %v616_v2 }
  0x1c   : > { %s5598_s26 = scalar_lea.vmem %s7135_s0, %s4350_s20  ;;  %4921 = vmatprep.subr.mxu0 %v615_v3  ;;  %5363 = vmatprep.subr.mxu1 %v615_v3  ;;  %s4347_s20 = sshll.u32 %s5554_s17, 7 }
  0x1d   : > { %v358_v5 = vld [vmem:[%s5598_s26] sm:$0xff]  ;;  %4922 = vmatpush3.msra.mxu0 %v615_v3  ;;  %v359_v6 = vld [vmem:[%s5598_s26 + $0x8] sm:$0xff]  ;;  %v360_v7 = vld [vmem:[%s5598_s26 + $0x10] sm:$0xff]  ;;  %5368 = vmatpush3.msra.mxu1 %v615_v3  ;;  %s7086_s29 = scalar_lea.hbm %s7131_s10, %s4347_s20  ;;  %s5477_s17 = smov [#allocation2]  }
  0x1e   : > { %4925 = vmatprep.mubr.msk.f32.mxu0 %vm626_vm1, %v358_v5  ;;  %4923 = vmatprep.subr.mxu0 %v614_v4  ;;  %v361_v8 = vld [vmem:[%s5598_s26 + $0x18] sm:$0xff]  ;;  %v362_v9 = vld [vmem:[%s5598_s26 + $0x20] sm:$0xff]  ;;  %v363_v10 = vld [vmem:[%s5598_s26 + $0x28] sm:$0xff] }
  0x1f   : > { %4924 = vmatpush3.msra.mxu0 %v614_v4  ;;  %5364 = vmatprep.subr.mxu1 %v614_v4  ;;  %v364_v11 = vld [vmem:[%s5598_s26 + $0x30] sm:$0xff]  ;;  %v365_v12 = vld [vmem:[%s5598_s26 + $0x38] sm:$0xff]  ;;  %v366_v13 = vld [vmem:[%s5598_s26 + $0x40] sm:$0xff] }
  0x20   : > { %4926 = vmatmul.mubr.msk.f32.vlgmr.msra.gmra.mxu0 %vm626_vm1, %v359_v6  ;;  %5369 = vmatpush3.msra.mxu1 %v614_v4  ;;  %v367_v14 = vld [vmem:[%s5598_s26 + $0x48] sm:$0xff]  ;;  %v368_v15 = vld [vmem:[%s5598_s26 + $0x50] sm:$0xff]  ;;  %v369_v16 = vld [vmem:[%s5598_s26 + $0x58] sm:$0xff] }
  0x21   : > { %4928 = vmatprep.mubr.msk.f32.mxu0 %vm626_vm1, %v360_v7  ;;  %v370_v17 = vld [vmem:[%s5598_s26 + $0x60] sm:$0xff]  ;;  %v371_v18 = vld [vmem:[%s5598_s26 + $0x68] sm:$0xff]  ;;  %v372_v19 = vld [vmem:[%s5598_s26 + $0x70] sm:$0xff] }
  0x22   : > { %v373_v20 = vld [vmem:[%s5598_s26 + $0x78] sm:$0xff]  ;;  %v374_v21 = vld [vmem:[%s5598_s26 + $0x80] sm:$0xff]  ;;  %v375_v22 = vld [vmem:[%s5598_s26 + $0x88] sm:$0xff] }
  0x23   : > { %v376_v23 = vld [vmem:[%s5598_s26 + $0x90] sm:$0xff]  ;;  %v377_v24 = vld [vmem:[%s5598_s26 + $0x98] sm:$0xff]  ;;  %v378_v25 = vld [vmem:[%s5598_s26 + $0xa0] sm:$0xff] }
  0x24   : > { %4929 = vmatmul.mubr.msk.f32.gmra.mxu0 %vm626_vm1, %v361_v8  ;;  %v379_v26 = vld [vmem:[%s5598_s26 + $0xa8] sm:$0xff]  ;;  %v380_v27 = vld [vmem:[%s5598_s26 + $0xb0] sm:$0xff]  ;;  %v381_v28 = vld [vmem:[%s5598_s26 + $0xb8] sm:$0xff] }
  0x25   : > { %4931 = vmatprep.mubr.msk.f32.mxu0 %vm626_vm1, %v362_v9  ;;  %v382_v29 = vld [vmem:[%s5598_s26 + $0xc0] sm:$0xff]  ;;  %v383_v30 = vld [vmem:[%s5598_s26 + $0xc8] sm:$0xff]  ;;  %v384_v31 = vld [vmem:[%s5598_s26 + $0xd0] sm:$0xff] }
  0x26   : > { %v385_v32 = vld [vmem:[%s5598_s26 + $0xd8] sm:$0xff]  ;;  %v386_v33 = vld [vmem:[%s5598_s26 + $0xe0] sm:$0xff]  ;;  %v387_v34 = vld [vmem:[%s5598_s26 + $0xe8] sm:$0xff] }
  0x27   : > { %v388_v35 = vld [vmem:[%s5598_s26 + $0xf0] sm:$0xff]  ;;  %v389_v36 = vld [vmem:[%s5598_s26 + $0xf8] sm:$0xff]  ;;  %v390_v37 = vld [vmem:[%s5598_s26 + $0x100] sm:$0xff] }
  0x28   : > { %4932 = vmatmul.mubr.msk.f32.gmra.mxu0 %vm626_vm1, %v363_v10  ;;  %v391_v38 = vld [vmem:[%s5598_s26 + $0x108] sm:$0xff]  ;;  %v392_v39 = vld [vmem:[%s5598_s26 + $0x110] sm:$0xff]  ;;  %v393_v40 = vld [vmem:[%s5598_s26 + $0x118] sm:$0xff] }
  0x29   : > { %4934 = vmatprep.mubr.msk.f32.mxu0 %vm626_vm1, %v364_v11  ;;  %v394_v41 = vld [vmem:[%s5598_s26 + $0x120] sm:$0xff]  ;;  %v552_v42 = vld [vmem:[%s5598_s26 + $0x610] sm:$0xff]  ;;  %v395_v43 = vld [vmem:[%s5598_s26 + $0x128] sm:$0xff] }
  0x2a   : > { %5216 = vmatprep.mubr.msk.f32.mxu1 %vm626_vm1, %v552_v42  ;;  %v553_v44 = vld [vmem:[%s5598_s26 + $0x618] sm:$0xff]  ;;  %v396_v45 = vld [vmem:[%s5598_s26 + $0x130] sm:$0xff]  ;;  %v554_v46 = vld [vmem:[%s5598_s26 + $0x620] sm:$0xff] }
  0x2b   : > { %5217 = vmatmul.mubr.msk.f32.vlgmr.msra.gmra.mxu1 %vm626_vm1, %v553_v44  ;;  %v397_v47 = vld [vmem:[%s5598_s26 + $0x138] sm:$0xff]  ;;  %v555_v48 = vld [vmem:[%s5598_s26 + $0x628] sm:$0xff]  ;;  %v398_v49 = vld [vmem:[%s5598_s26 + $0x140] sm:$0xff] }
  0x2c   : > { %4935 = vmatmul.mubr.msk.f32.gmra.mxu0 %vm626_vm1, %v365_v12  ;;  %5219 = vmatprep.mubr.msk.f32.mxu1 %vm626_vm1, %v554_v46  ;;  %v556_v50 = vld [vmem:[%s5598_s26 + $0x630] sm:$0xff]  ;;  %v399_v51 = vld [vmem:[%s5598_s26 + $0x148] sm:$0xff]  ;;  %v557_v52 = vld [vmem:[%s5598_s26 + $0x638] sm:$0xff] }
  0x2d   : > { %4937 = vmatprep.mubr.msk.f32.mxu0 %vm626_vm1, %v366_v13  ;;  %v400_v53 = vld [vmem:[%s5598_s26 + $0x150] sm:$0xff]  ;;  %v558_v54 = vld [vmem:[%s5598_s26 + $0x640] sm:$0xff]  ;;  %v401_v55 = vld [vmem:[%s5598_s26 + $0x158] sm:$0xff] }
  0x2e   : > { %v559_v56 = vld [vmem:[%s5598_s26 + $0x648] sm:$0xff]  ;;  %v402_v57 = vld [vmem:[%s5598_s26 + $0x160] sm:$0xff]  ;;  %v560_v58 = vld [vmem:[%s5598_s26 + $0x650] sm:$0xff] }
  0x2f   : > { %5220 = vmatmul.mubr.msk.f32.gmra.mxu1 %vm626_vm1, %v555_v48  ;;  %v403_v59 = vld [vmem:[%s5598_s26 + $0x168] sm:$0xff]  ;;  %v561_v60 = vld [vmem:[%s5598_s26 + $0x658] sm:$0xff]  ;;  %v404_v61 = vld [vmem:[%s5598_s26 + $0x170] sm:$0xff] }
  0x30   : > { %4938 = vmatmul.mubr.msk.f32.gmra.mxu0 %vm626_vm1, %v367_v14  ;;  %5222 = vmatprep.mubr.msk.f32.mxu1 %vm626_vm1, %v556_v50  ;;  %v562_v62 = vld [vmem:[%s5598_s26 + $0x660] sm:$0xff]  ;;  %v405_v63 = vld [vmem:[%s5598_s26 + $0x178] sm:$0xff]  ;;  %v563_v0 = vld [vmem:[%s5598_s26 + $0x668] sm:$0xff] }
  0x31   : > { %4940 = vmatprep.mubr.msk.f32.mxu0 %vm626_vm1, %v368_v15  ;;  %v406_v1 = vld [vmem:[%s5598_s26 + $0x180] sm:$0xff]  ;;  %v564_v2 = vld [vmem:[%s5598_s26 + $0x670] sm:$0xff]  ;;  %v407_v3 = vld [vmem:[%s5598_s26 + $0x188] sm:$0xff] }
  0x32   : > { %v565_v4 = vld [vmem:[%s5598_s26 + $0x678] sm:$0xff]  ;;  %v408_v5 = vld [vmem:[%s5598_s26 + $0x190] sm:$0xff]  ;;  %v566_v6 = vld [vmem:[%s5598_s26 + $0x680] sm:$0xff] }
  0x33   : > { %5223 = vmatmul.mubr.msk.f32.gmra.mxu1 %vm626_vm1, %v557_v52  ;;  %v409_v7 = vld [vmem:[%s5598_s26 + $0x198] sm:$0xff]  ;;  %v567_v8 = vld [vmem:[%s5598_s26 + $0x688] sm:$0xff]  ;;  %v410_v9 = vld [vmem:[%s5598_s26 + $0x1a0] sm:$0xff] }
  0x34   : > { %4941 = vmatmul.mubr.msk.f32.gmra.mxu0 %vm626_vm1, %v369_v16  ;;  %5225 = vmatprep.mubr.msk.f32.mxu1 %vm626_vm1, %v558_v54  ;;  %v568_v10 = vld [vmem:[%s5598_s26 + $0x690] sm:$0xff]  ;;  %v411_v11 = vld [vmem:[%s5598_s26 + $0x1a8] sm:$0xff]  ;;  %v569_v12 = vld [vmem:[%s5598_s26 + $0x698] sm:$0xff] }
  0x35   : > { %4943 = vmatprep.mubr.msk.f32.mxu0 %vm626_vm1, %v370_v17  ;;  %v412_v13 = vld [vmem:[%s5598_s26 + $0x1b0] sm:$0xff]  ;;  %v570_v14 = vld [vmem:[%s5598_s26 + $0x6a0] sm:$0xff]  ;;  %v413_v15 = vld [vmem:[%s5598_s26 + $0x1b8] sm:$0xff] }
  0x36   : > { %v571_v16 = vld [vmem:[%s5598_s26 + $0x6a8] sm:$0xff]  ;;  %v414_v17 = vld [vmem:[%s5598_s26 + $0x1c0] sm:$0xff]  ;;  %v584_v42 = vld [vmem:[%s5598_s26 + $0x710] sm:$0xff] }
  0x37   : > { %5226 = vmatmul.mubr.msk.f32.gmra.mxu1 %vm626_vm1, %v559_v56  ;;  %v585_v44 = vld [vmem:[%s5598_s26 + $0x718] sm:$0xff]  ;;  %v586_v46 = vld [vmem:[%s5598_s26 + $0x720] sm:$0xff]  ;;  %v587_v48 = vld [vmem:[%s5598_s26 + $0x728] sm:$0xff] }
  0x38   : > { %4944 = vmatmul.mubr.msk.f32.gmra.mxu0 %vm626_vm1, %v371_v18  ;;  %5228 = vmatprep.mubr.msk.f32.mxu1 %vm626_vm1, %v560_v58  ;;  %v572_v18 = vld [vmem:[%s5598_s26 + $0x6b0] sm:$0xff]  ;;  %v589_v52 = vld [vmem:[%s5598_s26 + $0x738] sm:$0xff]  ;;  %v590_v54 = vld [vmem:[%s5598_s26 + $0x740] sm:$0xff] }
  0x39   : > { %4946 = vmatprep.mubr.msk.f32.mxu0 %vm626_vm1, %v372_v19  ;;  %v415_v19 = vld [vmem:[%s5598_s26 + $0x1c8] sm:$0xff]  ;;  %v588_v50 = vld [vmem:[%s5598_s26 + $0x730] sm:$0xff] }
  0x3a   : > { %v591_v56 = vld [vmem:[%s5598_s26 + $0x748] sm:$0xff]  ;;  %v592_v58 = vld [vmem:[%s5598_s26 + $0x750] sm:$0xff] }
  0x3b   : > { %5229 = vmatmul.mubr.msk.f32.gmra.mxu1 %vm626_vm1, %v561_v60  ;;  %v593_v60 = vld [vmem:[%s5598_s26 + $0x758] sm:$0xff] }
  0x3c   : > { %4947 = vmatmul.mubr.msk.f32.gmra.mxu0 %vm626_vm1, %v373_v20  ;;  %5231 = vmatprep.mubr.msk.f32.mxu1 %vm626_vm1, %v562_v62  ;;  %v573_v20 = vld [vmem:[%s5598_s26 + $0x6b8] sm:$0xff]  ;;  %v594_v62 = vld [vmem:[%s5598_s26 + $0x760] sm:$0xff] }
  0x3d   : > { %4949 = vmatprep.mubr.msk.f32.mxu0 %vm626_vm1, %v374_v21  ;;  %v416_v21 = vld [vmem:[%s5598_s26 + $0x1d0] sm:$0xff] }
  0x3f   : > { %5232 = vmatmul.mubr.msk.f32.gmra.mxu1 %vm626_vm1, %v563_v0  ;;  %v595_v0 = vld [vmem:[%s5598_s26 + $0x768] sm:$0xff] }
  0x40   : > { %4950 = vmatmul.mubr.msk.f32.gmra.mxu0 %vm626_vm1, %v375_v22  ;;  %5234 = vmatprep.mubr.msk.f32.mxu1 %vm626_vm1, %v564_v2  ;;  %v574_v22 = vld [vmem:[%s5598_s26 + $0x6c0] sm:$0xff]  ;;  %v596_v2 = vld [vmem:[%s5598_s26 + $0x770] sm:$0xff] }
  0x41   : > { %4952 = vmatprep.mubr.msk.f32.mxu0 %vm626_vm1, %v376_v23  ;;  %v417_v23 = vld [vmem:[%s5598_s26 + $0x1d8] sm:$0xff] }
  0x43   : > { %5235 = vmatmul.mubr.msk.f32.gmra.mxu1 %vm626_vm1, %v565_v4  ;;  %v597_v4 = vld [vmem:[%s5598_s26 + $0x778] sm:$0xff] }
  0x44   : > { %4953 = vmatmul.mubr.msk.f32.gmra.mxu0 %vm626_vm1, %v377_v24  ;;  %5237 = vmatprep.mubr.msk.f32.mxu1 %vm626_vm1, %v566_v6  ;;  %v575_v24 = vld [vmem:[%s5598_s26 + $0x6c8] sm:$0xff]  ;;  %v598_v6 = vld [vmem:[%s5598_s26 + $0x780] sm:$0xff] }
  0x45   : > { %4955 = vmatprep.mubr.msk.f32.mxu0 %vm626_vm1, %v378_v25  ;;  %v418_v25 = vld [vmem:[%s5598_s26 + $0x1e0] sm:$0xff] }
  0x47   : > { %5238 = vmatmul.mubr.msk.f32.gmra.mxu1 %vm626_vm1, %v567_v8  ;;  %v599_v8 = vld [vmem:[%s5598_s26 + $0x788] sm:$0xff] }
  0x48   : > { %4956 = vmatmul.mubr.msk.f32.gmra.mxu0 %vm626_vm1, %v379_v26  ;;  %5240 = vmatprep.mubr.msk.f32.mxu1 %vm626_vm1, %v568_v10  ;;  %v576_v26 = vld [vmem:[%s5598_s26 + $0x6d0] sm:$0xff] }
  0x49   : > { %4958 = vmatprep.mubr.msk.f32.mxu0 %vm626_vm1, %v380_v27  ;;  %v419_v27 = vld [vmem:[%s5598_s26 + $0x1e8] sm:$0xff]  ;;  %v600_v10 = vld [vmem:[%s5598_s26 + $0x790] sm:$0xff] }
  0x4b   : > { %5241 = vmatmul.mubr.msk.f32.gmra.mxu1 %vm626_vm1, %v569_v12  ;;  %v601_v12 = vld [vmem:[%s5598_s26 + $0x798] sm:$0xff] }
  0x4c   : > { %4959 = vmatmul.mubr.msk.f32.gmra.mxu0 %vm626_vm1, %v381_v28  ;;  %5243 = vmatprep.mubr.msk.f32.mxu1 %vm626_vm1, %v570_v14  ;;  %v577_v28 = vld [vmem:[%s5598_s26 + $0x6d8] sm:$0xff]  ;;  %v602_v14 = vld [vmem:[%s5598_s26 + $0x7a0] sm:$0xff] }
  0x4d   : > { %4961 = vmatprep.mubr.msk.f32.mxu0 %vm626_vm1, %v382_v29  ;;  %v420_v29 = vld [vmem:[%s5598_s26 + $0x1f0] sm:$0xff] }
  0x4f   : > { %5244 = vmatmul.mubr.msk.f32.gmra.mxu1 %vm626_vm1, %v571_v16  ;;  %v603_v16 = vld [vmem:[%s5598_s26 + $0x7a8] sm:$0xff] }
  0x50   : > { %4962 = vmatmul.mubr.msk.f32.gmra.mxu0 %vm626_vm1, %v383_v30  ;;  %5246 = vmatprep.mubr.msk.f32.mxu1 %vm626_vm1, %v572_v18  ;;  %v578_v30 = vld [vmem:[%s5598_s26 + $0x6e0] sm:$0xff]  ;;  %v604_v18 = vld [vmem:[%s5598_s26 + $0x7b0] sm:$0xff] }
  0x51   : > { %4964 = vmatprep.mubr.msk.f32.mxu0 %vm626_vm1, %v384_v31  ;;  %v421_v31 = vld [vmem:[%s5598_s26 + $0x1f8] sm:$0xff] }
  0x53   : > { %5247 = vmatmul.mubr.msk.f32.gmra.mxu1 %vm626_vm1, %v573_v20  ;;  %v605_v20 = vld [vmem:[%s5598_s26 + $0x7b8] sm:$0xff] }
  0x54   : > { %4965 = vmatmul.mubr.msk.f32.gmra.mxu0 %vm626_vm1, %v385_v32  ;;  %5249 = vmatprep.mubr.msk.f32.mxu1 %vm626_vm1, %v574_v22  ;;  %v579_v32 = vld [vmem:[%s5598_s26 + $0x6e8] sm:$0xff]  ;;  %v606_v22 = vld [vmem:[%s5598_s26 + $0x7c0] sm:$0xff] }
  0x55   : > { %4967 = vmatprep.mubr.msk.f32.mxu0 %vm626_vm1, %v386_v33  ;;  %v422_v33 = vld [vmem:[%s5598_s26 + $0x200] sm:$0xff] }
  0x57   : > { %5250 = vmatmul.mubr.msk.f32.gmra.mxu1 %vm626_vm1, %v575_v24  ;;  %v607_v24 = vld [vmem:[%s5598_s26 + $0x7c8] sm:$0xff] }
  0x58   : > { %4968 = vmatmul.mubr.msk.f32.gmra.mxu0 %vm626_vm1, %v387_v34  ;;  %5252 = vmatprep.mubr.msk.f32.mxu1 %vm626_vm1, %v576_v26  ;;  %v580_v34 = vld [vmem:[%s5598_s26 + $0x6f0] sm:$0xff] }
  0x59   : > { %4970 = vmatprep.mubr.msk.f32.mxu0 %vm626_vm1, %v388_v35  ;;  %v423_v35 = vld [vmem:[%s5598_s26 + $0x208] sm:$0xff]  ;;  %v608_v26 = vld [vmem:[%s5598_s26 + $0x7d0] sm:$0xff] }
  0x5b   : > { %5253 = vmatmul.mubr.msk.f32.gmra.mxu1 %vm626_vm1, %v577_v28  ;;  %v609_v28 = vld [vmem:[%s5598_s26 + $0x7d8] sm:$0xff] }
  0x5c   : > { %4971 = vmatmul.mubr.msk.f32.gmra.mxu0 %vm626_vm1, %v389_v36  ;;  %5255 = vmatprep.mubr.msk.f32.mxu1 %vm626_vm1, %v578_v30  ;;  %v581_v36 = vld [vmem:[%s5598_s26 + $0x6f8] sm:$0xff]  ;;  %v610_v30 = vld [vmem:[%s5598_s26 + $0x7e0] sm:$0xff] }
  0x5d   : > { %4973 = vmatprep.mubr.msk.f32.mxu0 %vm626_vm1, %v390_v37  ;;  %v424_v37 = vld [vmem:[%s5598_s26 + $0x210] sm:$0xff] }
  0x5f   : > { %5256 = vmatmul.mubr.msk.f32.gmra.mxu1 %vm626_vm1, %v579_v32  ;;  %v611_v32 = vld [vmem:[%s5598_s26 + $0x7e8] sm:$0xff] }
  0x60   : > { %4974 = vmatmul.mubr.msk.f32.gmra.mxu0 %vm626_vm1, %v391_v38  ;;  %5258 = vmatprep.mubr.msk.f32.mxu1 %vm626_vm1, %v580_v34  ;;  %v582_v38 = vld [vmem:[%s5598_s26 + $0x700] sm:$0xff]  ;;  %v612_v34 = vld [vmem:[%s5598_s26 + $0x7f0] sm:$0xff] }
  0x61   : > { %4976 = vmatprep.mubr.msk.f32.mxu0 %vm626_vm1, %v392_v39  ;;  %v425_v39 = vld [vmem:[%s5598_s26 + $0x218] sm:$0xff] }
  0x63   : > { %5259 = vmatmul.mubr.msk.f32.gmra.mxu1 %vm626_vm1, %v581_v36  ;;  %v613_v36 = vld [vmem:[%s5598_s26 + $0x7f8] sm:$0xff] }
  0x64   : > { %4977 = vmatmul.mubr.msk.f32.gmra.mxu0 %vm626_vm1, %v393_v40  ;;  %5261 = vmatprep.mubr.msk.f32.mxu1 %vm626_vm1, %v582_v38  ;;  %v583_v40 = vld [vmem:[%s5598_s26 + $0x708] sm:$0xff] }
  0x65   : > { %4979 = vmatprep.mubr.msk.f32.mxu0 %vm626_vm1, %v394_v41  ;;  %v426_v41 = vld [vmem:[%s5598_s26 + $0x220] sm:$0xff] }
  0x67   : > { %5262 = vmatmul.mubr.msk.f32.gmra.mxu1 %vm626_vm1, %v583_v40  ;;  %v457_v40 = vld [vmem:[%s5598_s26 + $0x318] sm:$0xff] }
  0x68   : > { %4980 = vmatmul.mubr.msk.f32.gmra.mxu0 %vm626_vm1, %v395_v43  ;;  %v427_v43 = vld [vmem:[%s5598_s26 + $0x228] sm:$0xff]  ;;  %5264 = vmatprep.mubr.msk.f32.mxu1 %vm626_vm1, %v584_v42  ;;  %v458_v42 = vld [vmem:[%s5598_s26 + $0x320] sm:$0xff] }
  0x69   : > { %4982 = vmatprep.mubr.msk.f32.mxu0 %vm626_vm1, %v396_v45  ;;  %v428_v45 = vld [vmem:[%s5598_s26 + $0x230] sm:$0xff] }
  0x6b   : > { %5265 = vmatmul.mubr.msk.f32.gmra.mxu1 %vm626_vm1, %v585_v44  ;;  %v459_v44 = vld [vmem:[%s5598_s26 + $0x328] sm:$0xff] }
  0x6c   : > { %4983 = vmatmul.mubr.msk.f32.gmra.mxu0 %vm626_vm1, %v397_v47  ;;  %v429_v47 = vld [vmem:[%s5598_s26 + $0x238] sm:$0xff]  ;;  %5267 = vmatprep.mubr.msk.f32.mxu1 %vm626_vm1, %v586_v46  ;;  %v460_v46 = vld [vmem:[%s5598_s26 + $0x330] sm:$0xff] }
  0x6d   : > { %4985 = vmatprep.mubr.msk.f32.mxu0 %vm626_vm1, %v398_v49  ;;  %v430_v49 = vld [vmem:[%s5598_s26 + $0x240] sm:$0xff] }
  0x6f   : > { %5268 = vmatmul.mubr.msk.f32.gmra.mxu1 %vm626_vm1, %v587_v48  ;;  %v461_v48 = vld [vmem:[%s5598_s26 + $0x338] sm:$0xff] }
  0x70   : > { %4986 = vmatmul.mubr.msk.f32.gmra.mxu0 %vm626_vm1, %v399_v51  ;;  %v431_v51 = vld [vmem:[%s5598_s26 + $0x248] sm:$0xff]  ;;  %5270 = vmatprep.mubr.msk.f32.mxu1 %vm626_vm1, %v588_v50  ;;  %v462_v50 = vld [vmem:[%s5598_s26 + $0x340] sm:$0xff] }
  0x71   : > { %4988 = vmatprep.mubr.msk.f32.mxu0 %vm626_vm1, %v400_v53  ;;  %v432_v53 = vld [vmem:[%s5598_s26 + $0x250] sm:$0xff] }
  0x73   : > { %5271 = vmatmul.mubr.msk.f32.gmra.mxu1 %vm626_vm1, %v589_v52  ;;  %v463_v52 = vld [vmem:[%s5598_s26 + $0x348] sm:$0xff] }
  0x74   : > { %4989 = vmatmul.mubr.msk.f32.gmra.mxu0 %vm626_vm1, %v401_v55  ;;  %v433_v55 = vld [vmem:[%s5598_s26 + $0x258] sm:$0xff]  ;;  %5273 = vmatprep.mubr.msk.f32.mxu1 %vm626_vm1, %v590_v54  ;;  %v464_v54 = vld [vmem:[%s5598_s26 + $0x350] sm:$0xff] }
  0x75   : > { %4991 = vmatprep.mubr.msk.f32.mxu0 %vm626_vm1, %v402_v57  ;;  %v434_v57 = vld [vmem:[%s5598_s26 + $0x260] sm:$0xff] }
  0x77   : > { %5274 = vmatmul.mubr.msk.f32.gmra.mxu1 %vm626_vm1, %v591_v56  ;;  %v465_v56 = vld [vmem:[%s5598_s26 + $0x358] sm:$0xff] }
  0x78   : > { %4992 = vmatmul.mubr.msk.f32.gmra.mxu0 %vm626_vm1, %v403_v59  ;;  %v435_v59 = vld [vmem:[%s5598_s26 + $0x268] sm:$0xff]  ;;  %5276 = vmatprep.mubr.msk.f32.mxu1 %vm626_vm1, %v592_v58  ;;  %v466_v58 = vld [vmem:[%s5598_s26 + $0x360] sm:$0xff] }
  0x79   : > { %4994 = vmatprep.mubr.msk.f32.mxu0 %vm626_vm1, %v404_v61  ;;  %v436_v61 = vld [vmem:[%s5598_s26 + $0x270] sm:$0xff] }
  0x7b   : > { %5277 = vmatmul.mubr.msk.f32.gmra.mxu1 %vm626_vm1, %v593_v60  ;;  %v467_v60 = vld [vmem:[%s5598_s26 + $0x368] sm:$0xff] }
  0x7c   : > { %4995 = vmatmul.mubr.msk.f32.gmra.mxu0 %vm626_vm1, %v405_v63  ;;  %v437_v63 = vld [vmem:[%s5598_s26 + $0x278] sm:$0xff]  ;;  %5279 = vmatprep.mubr.msk.f32.mxu1 %vm626_vm1, %v594_v62  ;;  %v468_v62 = vld [vmem:[%s5598_s26 + $0x370] sm:$0xff] }
  0x7d   : > { %4997 = vmatprep.mubr.msk.f32.mxu0 %vm626_vm1, %v406_v1  ;;  %v438_v1 = vld [vmem:[%s5598_s26 + $0x280] sm:$0xff] }
  0x7f   : > { %5280 = vmatmul.mubr.msk.f32.gmra.mxu1 %vm626_vm1, %v595_v0  ;;  %v469_v0 = vld [vmem:[%s5598_s26 + $0x378] sm:$0xff] }
  0x80   : > { %4998 = vmatmul.mubr.msk.f32.gmra.mxu0 %vm626_vm1, %v407_v3  ;;  %v439_v3 = vld [vmem:[%s5598_s26 + $0x288] sm:$0xff]  ;;  %5282 = vmatprep.mubr.msk.f32.mxu1 %vm626_vm1, %v596_v2  ;;  %v470_v2 = vld [vmem:[%s5598_s26 + $0x380] sm:$0xff] }
  0x81   : > { %5000 = vmatprep.mubr.msk.f32.mxu0 %vm626_vm1, %v408_v5  ;;  %v440_v5 = vld [vmem:[%s5598_s26 + $0x290] sm:$0xff] }
  0x83   : > { %5283 = vmatmul.mubr.msk.f32.gmra.mxu1 %vm626_vm1, %v597_v4  ;;  %v471_v4 = vld [vmem:[%s5598_s26 + $0x388] sm:$0xff] }
  0x84   : > { %5001 = vmatmul.mubr.msk.f32.gmra.mxu0 %vm626_vm1, %v409_v7  ;;  %v441_v7 = vld [vmem:[%s5598_s26 + $0x298] sm:$0xff]  ;;  %5285 = vmatprep.mubr.msk.f32.mxu1 %vm626_vm1, %v598_v6  ;;  %v472_v6 = vld [vmem:[%s5598_s26 + $0x390] sm:$0xff] }
  0x85   : > { %5003 = vmatprep.mubr.msk.f32.mxu0 %vm626_vm1, %v410_v9  ;;  %v442_v9 = vld [vmem:[%s5598_s26 + $0x2a0] sm:$0xff] }
  0x87   : > { %5286 = vmatmul.mubr.msk.f32.gmra.mxu1 %vm626_vm1, %v599_v8  ;;  %v473_v8 = vld [vmem:[%s5598_s26 + $0x398] sm:$0xff] }
  0x88   : > { %5004 = vmatmul.mubr.msk.f32.gmra.mxu0 %vm626_vm1, %v411_v11  ;;  %v443_v11 = vld [vmem:[%s5598_s26 + $0x2a8] sm:$0xff]  ;;  %5288 = vmatprep.mubr.msk.f32.mxu1 %vm626_vm1, %v600_v10  ;;  %v474_v10 = vld [vmem:[%s5598_s26 + $0x3a0] sm:$0xff] }
  0x89   : > { %5006 = vmatprep.mubr.msk.f32.mxu0 %vm626_vm1, %v412_v13  ;;  %v444_v13 = vld [vmem:[%s5598_s26 + $0x2b0] sm:$0xff] }
  0x8b   : > { %5289 = vmatmul.mubr.msk.f32.gmra.mxu1 %vm626_vm1, %v601_v12  ;;  %v475_v12 = vld [vmem:[%s5598_s26 + $0x3a8] sm:$0xff] }
  0x8c   : > { %5007 = vmatmul.mubr.msk.f32.gmra.mxu0 %vm626_vm1, %v413_v15  ;;  %v445_v15 = vld [vmem:[%s5598_s26 + $0x2b8] sm:$0xff]  ;;  %5291 = vmatprep.mubr.msk.f32.mxu1 %vm626_vm1, %v602_v14  ;;  %v476_v14 = vld [vmem:[%s5598_s26 + $0x3b0] sm:$0xff] }
  0x8d   : > { %5009 = vmatprep.mubr.msk.f32.mxu0 %vm626_vm1, %v414_v17  ;;  %v446_v17 = vld [vmem:[%s5598_s26 + $0x2c0] sm:$0xff] }
  0x8f   : > { %5292 = vmatmul.mubr.msk.f32.gmra.mxu1 %vm626_vm1, %v603_v16  ;;  %v477_v16 = vld [vmem:[%s5598_s26 + $0x3b8] sm:$0xff] }
  0x90   : > { %5010 = vmatmul.mubr.msk.f32.gmra.mxu0 %vm626_vm1, %v415_v19  ;;  %v447_v19 = vld [vmem:[%s5598_s26 + $0x2c8] sm:$0xff]  ;;  %5294 = vmatprep.mubr.msk.f32.mxu1 %vm626_vm1, %v604_v18  ;;  %v478_v18 = vld [vmem:[%s5598_s26 + $0x3c0] sm:$0xff] }
  0x91   : > { %5012 = vmatprep.mubr.msk.f32.mxu0 %vm626_vm1, %v416_v21  ;;  %v448_v21 = vld [vmem:[%s5598_s26 + $0x2d0] sm:$0xff] }
  0x93   : > { %5295 = vmatmul.mubr.msk.f32.gmra.mxu1 %vm626_vm1, %v605_v20  ;;  %v479_v20 = vld [vmem:[%s5598_s26 + $0x3c8] sm:$0xff] }
  0x94   : > { %5013 = vmatmul.mubr.msk.f32.gmra.mxu0 %vm626_vm1, %v417_v23  ;;  %v449_v23 = vld [vmem:[%s5598_s26 + $0x2d8] sm:$0xff]  ;;  %5297 = vmatprep.mubr.msk.f32.mxu1 %vm626_vm1, %v606_v22  ;;  %v480_v22 = vld [vmem:[%s5598_s26 + $0x3d0] sm:$0xff] }
  0x95   : > { %5015 = vmatprep.mubr.msk.f32.mxu0 %vm626_vm1, %v418_v25  ;;  %v450_v25 = vld [vmem:[%s5598_s26 + $0x2e0] sm:$0xff] }
  0x97   : > { %5298 = vmatmul.mubr.msk.f32.gmra.mxu1 %vm626_vm1, %v607_v24  ;;  %v481_v24 = vld [vmem:[%s5598_s26 + $0x3d8] sm:$0xff] }
  0x98   : > { %5016 = vmatmul.mubr.msk.f32.gmra.mxu0 %vm626_vm1, %v419_v27  ;;  %v451_v27 = vld [vmem:[%s5598_s26 + $0x2e8] sm:$0xff]  ;;  %5300 = vmatprep.mubr.msk.f32.mxu1 %vm626_vm1, %v608_v26  ;;  %v482_v26 = vld [vmem:[%s5598_s26 + $0x3e0] sm:$0xff] }
  0x99   : > { %5018 = vmatprep.mubr.msk.f32.mxu0 %vm626_vm1, %v420_v29  ;;  %v452_v29 = vld [vmem:[%s5598_s26 + $0x2f0] sm:$0xff] }
  0x9b   : > { %5301 = vmatmul.mubr.msk.f32.gmra.mxu1 %vm626_vm1, %v609_v28  ;;  %v483_v28 = vld [vmem:[%s5598_s26 + $0x3e8] sm:$0xff] }
  0x9c   : > { %5019 = vmatmul.mubr.msk.f32.gmra.mxu0 %vm626_vm1, %v421_v31  ;;  %v453_v31 = vld [vmem:[%s5598_s26 + $0x2f8] sm:$0xff]  ;;  %5303 = vmatprep.mubr.msk.f32.mxu1 %vm626_vm1, %v610_v30  ;;  %v484_v30 = vld [vmem:[%s5598_s26 + $0x3f0] sm:$0xff] }
  0x9d   : > { %5021 = vmatprep.mubr.msk.f32.mxu0 %vm626_vm1, %v422_v33  ;;  %v454_v33 = vld [vmem:[%s5598_s26 + $0x300] sm:$0xff] }
  0x9f   : > { %5304 = vmatmul.mubr.msk.f32.gmra.mxu1 %vm626_vm1, %v611_v32  ;;  %v485_v32 = vld [vmem:[%s5598_s26 + $0x3f8] sm:$0xff] }
  0xa0   : > { %5022 = vmatmul.mubr.msk.f32.gmra.mxu0 %vm626_vm1, %v423_v35  ;;  %v455_v35 = vld [vmem:[%s5598_s26 + $0x308] sm:$0xff]  ;;  %5306 = vmatprep.mubr.msk.f32.mxu1 %vm626_vm1, %v612_v34  ;;  %v486_v34 = vld [vmem:[%s5598_s26 + $0x400] sm:$0xff] }
  0xa1   : > { %5024 = vmatprep.mubr.msk.f32.mxu0 %vm626_vm1, %v424_v37  ;;  %v456_v37 = vld [vmem:[%s5598_s26 + $0x310] sm:$0xff] }
  0xa3   : > { %5307 = vmatmul.mubr.msk.f32.gmra.mxu1 %vm626_vm1, %v613_v36 }
  0xa4   : > { %5025 = vmatmul.mubr.msk.f32.gmra.mxu0 %vm626_vm1, %v425_v39  ;;  %v3001_v39 = vld [vmem:[%s7122_s1 + $0x8] sm:$0xff] }
  0xa5   : > { %5027 = vmatprep.mubr.msk.f32.mxu0 %vm626_vm1, %v426_v41  ;;  %3080 = vmatprep.mubr.f32.mxu1 %v3001_v39 }
  0xa8   : > { %5028 = vmatmul.mubr.msk.f32.gmra.mxu0 %vm626_vm1, %v427_v43 }
  0xa9   : > { %5030 = vmatprep.mubr.msk.f32.mxu0 %vm626_vm1, %v428_v45 }
  0xac   : > { %5031 = vmatmul.mubr.msk.f32.gmra.mxu0 %vm626_vm1, %v429_v47 }
  0xad   : > { %5033 = vmatprep.mubr.msk.f32.mxu0 %vm626_vm1, %v430_v49 }
  0xb0   : > { %5034 = vmatmul.mubr.msk.f32.gmra.mxu0 %vm626_vm1, %v431_v51 }
  0xb1   : > { %5036 = vmatprep.mubr.msk.f32.mxu0 %vm626_vm1, %v432_v53 }
  0xb4   : > { %5037 = vmatmul.mubr.msk.f32.gmra.mxu0 %vm626_vm1, %v433_v55 }
  0xb5   : > { %5039 = vmatprep.mubr.msk.f32.mxu0 %vm626_vm1, %v434_v57 }
  0xb8   : > { %5040 = vmatmul.mubr.msk.f32.gmra.mxu0 %vm626_vm1, %v435_v59 }
  0xb9   : > { %5042 = vmatprep.mubr.msk.f32.mxu0 %vm626_vm1, %v436_v61 }
  0xbc   : > { %5043 = vmatmul.mubr.msk.f32.gmra.mxu0 %vm626_vm1, %v437_v63 }
  0xbd   : > { %5045 = vmatprep.mubr.msk.f32.mxu0 %vm626_vm1, %v438_v1 }
  0xc0   : > { %5046 = vmatmul.mubr.msk.f32.gmra.mxu0 %vm626_vm1, %v439_v3 }
  0xc1   : > { %5048 = vmatprep.mubr.msk.f32.mxu0 %vm626_vm1, %v440_v5 }
  0xc4   : > { %5049 = vmatmul.mubr.msk.f32.gmra.mxu0 %vm626_vm1, %v441_v7 }
  0xc5   : > { %5051 = vmatprep.mubr.msk.f32.mxu0 %vm626_vm1, %v442_v9 }
  0xc8   : > { %5052 = vmatmul.mubr.msk.f32.gmra.mxu0 %vm626_vm1, %v443_v11 }
  0xc9   : > { %5054 = vmatprep.mubr.msk.f32.mxu0 %vm626_vm1, %v444_v13 }
  0xcc   : > { %5055 = vmatmul.mubr.msk.f32.gmra.mxu0 %vm626_vm1, %v445_v15 }
  0xcd   : > { %5057 = vmatprep.mubr.msk.f32.mxu0 %vm626_vm1, %v446_v17 }
  0xd0   : > { %5058 = vmatmul.mubr.msk.f32.gmra.mxu0 %vm626_vm1, %v447_v19 }
  0xd1   : > { %5060 = vmatprep.mubr.msk.f32.mxu0 %vm626_vm1, %v448_v21 }
  0xd4   : > { %5061 = vmatmul.mubr.msk.f32.gmra.mxu0 %vm626_vm1, %v449_v23 }
  0xd5   : > { %5063 = vmatprep.mubr.msk.f32.mxu0 %vm626_vm1, %v450_v25 }
  0xd8   : > { %5064 = vmatmul.mubr.msk.f32.gmra.mxu0 %vm626_vm1, %v451_v27 }
  0xd9   : > { %5066 = vmatprep.mubr.msk.f32.mxu0 %vm626_vm1, %v452_v29 }
  0xdc   : > { %5067 = vmatmul.mubr.msk.f32.gmra.mxu0 %vm626_vm1, %v453_v31 }
  0xdd   : > { %5069 = vmatprep.mubr.msk.f32.mxu0 %vm626_vm1, %v454_v33 }
  0xe0   : > { %v5923_v38 = vpop.f32.mrf.mxu0  ;;  %5070 = vmatmul.mubr.msk.f32.gmra.mxu0 %vm626_vm1, %v455_v35  ;;  %v6037_v35 = vld [vmem:[%s7124_s3] ss:$0 sm:$0xff] }
  0xe1   : > { %5072 = vmatprep.mubr.msk.f32.mxu0 %vm626_vm1, %v456_v37 }
  0xe2   : > { %v5931_v41 = vpop.f32.mrf.mxu0 }
  0xe4   : > { %v5934_v43 = vpop.f32.mrf.mxu0  ;;  %5073 = vmatmul.mubr.msk.f32.gmra.mxu0 %vm626_vm1, %v457_v40  ;;  %v487_v40 = vld [vmem:[%s5598_s26 + $0x408] sm:$0xff] }
  0xe5   : > { %5075 = vmatprep.mubr.msk.f32.mxu0 %vm626_vm1, %v458_v42 }
  0xe6   : > { %v5939_v45 = vpop.f32.mrf.mxu0 }
  0xe8   : > { %v5942_v47 = vpop.f32.mrf.mxu0  ;;  %5076 = vmatmul.mubr.msk.f32.gmra.mxu0 %vm626_vm1, %v459_v44 }
  0xe9   : > { %5078 = vmatprep.mubr.msk.f32.mxu0 %vm626_vm1, %v460_v46  ;;  %v488_v46 = vld [vmem:[%s5598_s26 + $0x410] sm:$0xff] }
  0xea   : > { %v5947_v49 = vpop.f32.mrf.mxu0 }
  0xec   : > { %v5950_v51 = vpop.f32.mrf.mxu0  ;;  %5079 = vmatmul.mubr.msk.f32.gmra.mxu0 %vm626_vm1, %v461_v48 }
  0xed   : > { %5081 = vmatprep.mubr.msk.f32.mxu0 %vm626_vm1, %v462_v50 }
  0xee   : > { %v5955_v53 = vpop.f32.mrf.mxu0 }
  0xf0   : > { %v5958_v55 = vpop.f32.mrf.mxu0  ;;  %5082 = vmatmul.mubr.msk.f32.gmra.mxu0 %vm626_vm1, %v463_v52 }
  0xf1   : > { %5084 = vmatprep.mubr.msk.f32.mxu0 %vm626_vm1, %v464_v54 }
  0xf2   : > { %v5963_v57 = vpop.f32.mrf.mxu0 }
  0xf4   : > { %v5966_v59 = vpop.f32.mrf.mxu0  ;;  %5085 = vmatmul.mubr.msk.f32.gmra.mxu0 %vm626_vm1, %v465_v56 }
  0xf5   : > { %5087 = vmatprep.mubr.msk.f32.mxu0 %vm626_vm1, %v466_v58 }
  0xf6   : > { %v5971_v61 = vpop.f32.mrf.mxu0 }
  0xf8   : > { %v5974_v63 = vpop.f32.mrf.mxu0  ;;  %5088 = vmatmul.mubr.msk.f32.gmra.mxu0 %vm626_vm1, %v467_v60 }
  0xf9   : > { %5090 = vmatprep.mubr.msk.f32.mxu0 %vm626_vm1, %v468_v62  ;;  %v1531_v54 = vadd.f32 %v5974_v63, %v6037_v35  ;;  %v490_v63 = vld [vmem:[%s5598_s26 + $0x420] sm:$0xff] }
  0xfa   : > { %v5979_v1 = vpop.f32.mrf.mxu0 }
  0xfc   : > { %v4948_v3 = vpop.f32.mrf.mxu0  ;;  %5091 = vmatmul.mubr.msk.f32.gmra.mxu0 %vm626_vm1, %v469_v0  ;;  %v489_v0 = vld [vmem:[%s5598_s26 + $0x418] sm:$0xff] }
  0xfd   : > { %5093 = vmatprep.mubr.msk.f32.mxu0 %vm626_vm1, %v470_v2  ;;  %v1541_v36 = vadd.f32 %v4948_v3, %v6037_v35  ;;  %v1526_v2 = vadd.f32 %v6037_v35, %v5979_v1 }
  0xfe   : > { %v1535_v5 = vpop.f32.mrf.mxu0 }
  0xff   : > { %v1536_v42 = vadd.f32 %v6037_v35, %v1535_v5  ;;  %v2759_v56 = vmax.f32 %v1541_v36, 0.0 }
 0x100   : > { %v5986_v7 = vpop.f32.mrf.mxu0  ;;  %5094 = vmatmul.mubr.msk.f32.gmra.mxu0 %vm626_vm1, %v471_v4 }
 0x101   : > { %5096 = vmatprep.mubr.msk.f32.mxu0 %vm626_vm1, %v472_v6  ;;  %v2758_v3 = vmax.f32 %v1536_v42, 0.0  ;;  %v1496_v42 = vadd.f32 %v6037_v35, %v5955_v53 }
 0x102   : > { %v5991_v9 = vpop.f32.mrf.mxu0 }
 0x104   : > { %v5994_v11 = vpop.f32.mrf.mxu0  ;;  %5097 = vmatmul.mubr.msk.f32.gmra.mxu0 %vm626_vm1, %v473_v8  ;;  %v1521_v8 = vadd.f32 %v5966_v59, %v6037_v35  ;;  %v492_v59 = vld [vmem:[%s5598_s26 + $0x430] sm:$0xff] }
 0x105   : > { %5099 = vmatprep.mubr.msk.f32.mxu0 %vm626_vm1, %v474_v10  ;;  %v2757_v10 = vmax.f32 %v1531_v54, 0.0 }
 0x106   : > { %v5999_v13 = vpop.f32.mrf.mxu0 }
 0x108   : > { %v6002_v15 = vpop.f32.mrf.mxu0  ;;  %5100 = vmatmul.mubr.msk.f32.gmra.mxu0 %vm626_vm1, %v475_v12 }
 0x109   : > { %5102 = vmatprep.mubr.msk.f32.mxu0 %vm626_vm1, %v476_v14 }
 0x10a   : > { %v6007_v17 = vpop.f32.mrf.mxu0 }
 0x10b   : > { %v1566_v53 = vadd.f32 %v6037_v35, %v6007_v17  ;;  %v1481_v17 = vadd.f32 %v5934_v43, %v6037_v35 }
 0x10c   : > { %v6010_v19 = vpop.f32.mrf.mxu0  ;;  %5103 = vmatmul.mubr.msk.f32.gmra.mxu0 %vm626_vm1, %v477_v16  ;;  %v491_v16 = vld [vmem:[%s5598_s26 + $0x428] sm:$0xff] }
 0x10d   : > { %5105 = vmatprep.mubr.msk.f32.mxu0 %vm626_vm1, %v478_v18  ;;  %v1516_v18 = vadd.f32 %v6037_v35, %v5971_v61 }
 0x10e   : > { %v6015_v21 = vpop.f32.mrf.mxu0 }
 0x110   : > { %v6018_v23 = vpop.f32.mrf.mxu0  ;;  %5106 = vmatmul.mubr.msk.f32.gmra.mxu0 %vm626_vm1, %v479_v20  ;;  %v2756_v20 = vmax.f32 %v1526_v2, 0.0  ;;  %v1561_v2 = vadd.f32 %v5994_v11, %v6037_v35  ;;  %v499_v11 = vld [vmem:[%s5598_s26 + $0x468] sm:$0xff] }
 0x111   : > { %5108 = vmatprep.mubr.msk.f32.mxu0 %vm626_vm1, %v480_v22 }
 0x112   : > { %v6023_v25 = vpop.f32.mrf.mxu0 }
 0x113   : > { %v1586_v61 = vadd.f32 %v6037_v35, %v6023_v25  ;;  %v1501_v25 = vadd.f32 %v5950_v51, %v6037_v35 }
 0x114   : > { %v4966_v27 = vpop.f32.mrf.mxu0  ;;  %5109 = vmatmul.mubr.msk.f32.gmra.mxu0 %vm626_vm1, %v481_v24  ;;  %v1591_v24 = vadd.f32 %v6018_v23, %v6037_v35  ;;  %v493_v23 = vld [vmem:[%s5598_s26 + $0x438] sm:$0xff] }
 0x115   : > { %5111 = vmatprep.mubr.msk.f32.mxu0 %vm626_vm1, %v482_v26  ;;  %v1601_v5 = vadd.f32 %v4966_v27, %v6037_v35  ;;  %v1511_v27 = vadd.f32 %v5958_v55, %v6037_v35 }
 0x116   : > { %v1595_v29 = vpop.f32.mrf.mxu0  ;;  %v2769_v36 = vmax.f32 %v1591_v24, 0.0  ;;  %v1466_v24 = vadd.f32 %v6037_v35, %v5931_v41  ;;  %v503_v41 = vld [vmem:[%s5598_s26 + $0x488] sm:$0xff] }
 0x117   : > { %v1596_v1 = vadd.f32 %v6037_v35, %v1595_v29  ;;  %v2771_v26 = vmax.f32 %v1601_v5, 0.0 }
 0x118   : > { %v4969_v31 = vpop.f32.mrf.mxu0  ;;  %5112 = vmatmul.mubr.msk.f32.gmra.mxu0 %vm626_vm1, %v483_v28  ;;  %v2755_v28 = vmax.f32 %v1521_v8, 0.0  ;;  %v1476_v8 = vadd.f32 %v6037_v35, %v5939_v45  ;;  %v1546_v45 = vadd.f32 %v6037_v35, %v5991_v9 }
 0x119   : > { %5114 = vmatprep.mubr.msk.f32.mxu0 %vm626_vm1, %v484_v30  ;;  %v1611_v48 = vadd.f32 %v4969_v31, %v6037_v35  ;;  %v2770_v30 = vmax.f32 %v1596_v1, 0.0  ;;  %v1506_v31 = vadd.f32 %v6037_v35, %v5963_v57  ;;  %v1576_v57 = vadd.f32 %v6037_v35, %v6015_v21  ;;  %v500_v1 = vld [vmem:[%s5598_s26 + $0x470] sm:$0xff] }
 0x11a   : > { %v1605_v33 = vpop.f32.mrf.mxu0  ;;  %v1491_v21 = vadd.f32 %v5942_v47, %v6037_v35  ;;  %v2760_v9 = vmax.f32 %v1546_v45, 0.0 }
 0x11b   : > { %v1606_v60 = vadd.f32 %v6037_v35, %v1605_v33  ;;  %v2773_v6 = vmax.f32 %v1611_v48, 0.0  ;;  %v494_v33 = vld [vmem:[%s5598_s26 + $0x440] sm:$0xff]  ;;  %v1571_v48 = vadd.f32 %v6002_v15, %v6037_v35  ;;  %v497_v15 = vld [vmem:[%s5598_s26 + $0x458] sm:$0xff] }
 0x11c   : > { %v4972_v37 = vpop.f32.mrf.mxu0  ;;  %5115 = vmatmul.mubr.msk.f32.gmra.mxu0 %vm626_vm1, %v485_v32  ;;  %v2754_v32 = vmax.f32 %v1516_v18, 0.0  ;;  %v2747_v18 = vmax.f32 %v1481_v17, 0.0  ;;  %v515_v17 = vld [vmem:[%s5598_s26 + $0x4e8] sm:$0xff] }
 0x11d   : > { %v1621_v39 = vadd.f32 %v4972_v37, %v6037_v35  ;;  %5117 = vmatprep.mubr.msk.f32.mxu0 %vm626_vm1, %v486_v34  ;;  %v2772_v14 = vmax.f32 %v1606_v60, 0.0  ;;  %v1581_v34 = vadd.f32 %v6010_v19, %v6037_v35  ;;  %v2753_v37 = vmax.f32 %v1511_v27, 0.0  ;;  %v495_v19 = vld [vmem:[%s5598_s26 + $0x448] sm:$0xff]  ;;  %v502_v27 = vld [vmem:[%s5598_s26 + $0x480] sm:$0xff] }
 0x11e   : > { %v1615_v44 = vpop.f32.mrf.mxu0  ;;  %v1486_v60 = vadd.f32 %v6037_v35, %v5947_v49  ;;  %v1556_v49 = vadd.f32 %v6037_v35, %v5999_v13  ;;  %v1471_v13 = vadd.f32 %v5923_v38, %v6037_v35 }
 0x11f   : > { %v2775_v50 = vmax.f32 %v1621_v39, 0.0  ;;  %v1616_v52 = vadd.f32 %v6037_v35, %v1615_v44  ;;  %v2752_v44 = vmax.f32 %v1506_v31, 0.0 }
 0x120   : > { %v6050_v58 = vpop.f32.mrf.mxu0  ;;  %5118 = vmatmul.mubr.msk.f32.gmra.mxu0 %vm626_vm1, %v487_v40  ;;  %v2768_v40 = vmax.f32 %v1586_v61, 0.0  ;;  %v2745_v61 = vmax.f32 %v1471_v13, 0.0  ;;  %v519_v13 = vld [vmem:[%s5598_s26 + $0x508] sm:$0xff] }
 0x121   : > { %v2774_v62 = vmax.f32 %v1616_v52, 0.0  ;;  %4612 = vmatprep.subr.mxu1 %v2775_v50  ;;  %5120 = vmatprep.mubr.msk.f32.mxu0 %vm626_vm1, %v488_v46  ;;  %v496_v46 = vld [vmem:[%s5598_s26 + $0x450] sm:$0xff]  ;;  %v2767_v50 = vmax.f32 %v1581_v34, 0.0  ;;  %v2751_v52 = vmax.f32 %v1501_v25, 0.0  ;;  %v3003_v34 = vld [vmem:[%s7122_s1 + $0x18] sm:$0xff] }
 0x122   : > { %v6058_v4 = vpop.f32.mrf.mxu0  ;;  %4613 = vmatpush3.msra.mxu1 %v2759_v56  ;;  %v2766_v56 = vmax.f32 %v1576_v57, 0.0  ;;  %v505_v25 = vld [vmem:[%s5598_s26 + $0x498] sm:$0xff]  ;;  %v506_v57 = vld [vmem:[%s5598_s26 + $0x4a0] sm:$0xff] }
 0x123   : > { %4614 = vmatprep.subr.mxu1 %v2774_v62  ;;  %v2750_v62 = vmax.f32 %v1496_v42, 0.0 }
 0x124   : > { %v6064_v12 = vpop.f32.mrf.mxu0  ;;  %5121 = vmatmul.mubr.msk.f32.gmra.mxu0 %vm626_vm1, %v489_v0  ;;  %4615 = vmatpush3.msra.mxu1 %v2758_v3  ;;  %v498_v0 = vld [vmem:[%s5598_s26 + $0x460] sm:$0xff]  ;;  %v2765_v3 = vmax.f32 %v1571_v48, 0.0  ;;  %v509_v48 = vld [vmem:[%s5598_s26 + $0x4b8] sm:$0xff] }
 0x125   : > { %4616 = vmatprep.subr.mxu1 %v2773_v6  ;;  %5123 = vmatprep.mubr.msk.f32.mxu0 %vm626_vm1, %v490_v63  ;;  %v2749_v63 = vmax.f32 %v1491_v21, 0.0  ;;  %v2764_v6 = vmax.f32 %v1566_v53, 0.0  ;;  %v510_v21 = vld [vmem:[%s5598_s26 + $0x4c0] sm:$0xff]  ;;  %v511_v53 = vld [vmem:[%s5598_s26 + $0x4c8] sm:$0xff] }
 0x126   : > { %v6072_v22 = vpop.f32.mrf.mxu0  ;;  %4617 = vmatpush3.msra.mxu1 %v2757_v10  ;;  %v2748_v10 = vmax.f32 %v1486_v60, 0.0 }
 0x127   : > { %4618 = vmatprep.subr.mxu1 %v2772_v14  ;;  %v1551_v14 = vadd.f32 %v5986_v7, %v6037_v35  ;;  %v501_v7 = vld [vmem:[%s5598_s26 + $0x478] sm:$0xff] }
 0x128   : > { %v6079_v29 = vpop.f32.mrf.mxu0  ;;  %5124 = vmatmul.mubr.msk.f32.gmra.mxu0 %vm626_vm1, %v491_v16  ;;  %4619 = vmatpush3.msra.mxu1 %v2756_v20  ;;  %v2763_v16 = vmax.f32 %v1561_v2, 0.0  ;;  %v514_v2 = vld [vmem:[%s5598_s26 + $0x4e0] sm:$0xff] }
 0x129   : > { %4620 = vmatprep.subr.mxu1 %v2771_v26  ;;  %5126 = vmatprep.mubr.msk.f32.mxu0 %vm626_vm1, %v492_v59  ;;  %v2762_v59 = vmax.f32 %v1556_v49, 0.0  ;;  %v2746_v26 = vmax.f32 %v1476_v8, 0.0  ;;  %v516_v49 = vld [vmem:[%s5598_s26 + $0x4f0] sm:$0xff] }
 0x12a   : > { %v6088_v55 = vpop.f32.mrf.mxu0  ;;  %4621 = vmatpush3.msra.mxu1 %v2755_v28  ;;  %v2761_v28 = vmax.f32 %v1551_v14, 0.0 }
 0x12b   : > { %4622 = vmatprep.subr.mxu1 %v2770_v30 }
 0x12c   : > { %v6095_v39 = vpop.f32.mrf.mxu0  ;;  %5127 = vmatmul.mubr.msk.f32.gmra.mxu0 %vm626_vm1, %v493_v23  ;;  %4623 = vmatpush3.msra.mxu1 %v2754_v32  ;;  %v2744_v23 = vmax.f32 %v1466_v24, 0.0  ;;  %v504_v32 = vld [vmem:[%s5598_s26 + $0x490] sm:$0xff] }
 0x12d   : > { %4624 = vmatprep.subr.mxu1 %v2769_v36  ;;  %5129 = vmatprep.mubr.msk.f32.mxu0 %vm626_vm1, %v494_v33  ;;  %v3000_v33 = vld [vmem:[%s7122_s1] sm:$0xff] }
 0x12e   : > { %v6104_v51 = vpop.f32.mrf.mxu0  ;;  %4625 = vmatpush3.msra.mxu1 %v2753_v37 }
 0x12f   : > { %4626 = vmatprep.subr.mxu1 %v2768_v40 }
 0x130   : > { %v6111_v54 = vpop.f32.mrf.mxu0  ;;  %5130 = vmatmul.mubr.msk.f32.gmra.mxu0 %vm626_vm1, %v495_v19  ;;  %4627 = vmatpush3.msra.mxu1 %v2752_v44  ;;  %v507_v19 = vld [vmem:[%s5598_s26 + $0x4a8] sm:$0xff]  ;;  %v508_v44 = vld [vmem:[%s5598_s26 + $0x4b0] sm:$0xff] }
 0x131   : > { %4628 = vmatprep.subr.mxu1 %v2767_v50  ;;  %5132 = vmatprep.mubr.msk.f32.mxu0 %vm626_vm1, %v496_v46 }
 0x132   : > { %v6120_v47 = vpop.f32.mrf.mxu0  ;;  %4629 = vmatpush3.msra.mxu1 %v2751_v52 }
 0x133   : > { %4630 = vmatprep.subr.mxu1 %v2766_v56 }
 0x134   : > { %v6127_v5 = vpop.f32.mrf.mxu0  ;;  %5133 = vmatmul.mubr.msk.f32.gmra.mxu0 %vm626_vm1, %v497_v15  ;;  %4631 = vmatpush3.msra.mxu1 %v2750_v62  ;;  %v512_v15 = vld [vmem:[%s5598_s26 + $0x4d0] sm:$0xff]  ;;  %v513_v62 = vld [vmem:[%s5598_s26 + $0x4d8] sm:$0xff] }
 0x135   : > { %4632 = vmatprep.subr.mxu1 %v2765_v3  ;;  %5135 = vmatprep.mubr.msk.f32.mxu0 %vm626_vm1, %v498_v0 }
 0x136   : > { %v6136_v43 = vpop.f32.mrf.mxu0  ;;  %4633 = vmatpush3.msra.mxu1 %v2749_v63 }
 0x137   : > { %4634 = vmatprep.subr.mxu1 %v2764_v6 }
 0x138   : > { %v6143_v20 = vpop.f32.mrf.mxu0  ;;  %5136 = vmatmul.mubr.msk.f32.gmra.mxu0 %vm626_vm1, %v499_v11  ;;  %4635 = vmatpush3.msra.mxu1 %v2748_v10  ;;  %v517_v11 = vld [vmem:[%s5598_s26 + $0x4f8] sm:$0xff]  ;;  %v518_v10 = vld [vmem:[%s5598_s26 + $0x500] sm:$0xff] }
 0x139   : > { %4636 = vmatprep.subr.mxu1 %v2763_v16  ;;  %5138 = vmatprep.mubr.msk.f32.mxu0 %vm626_vm1, %v500_v1 }
 0x13a   : > { %v6152_v38 = vpop.f32.mrf.mxu0  ;;  %4637 = vmatpush3.msra.mxu1 %v2747_v18 }
 0x13b   : > { %4638 = vmatprep.subr.mxu1 %v2762_v59  ;;  %v520_v59 = vld [vmem:[%s5598_s26 + $0x510] sm:$0xff] }
 0x13c   : > { %v4996_v30 = vpop.f32.mrf.mxu0  ;;  %5139 = vmatmul.mubr.msk.f32.gmra.mxu0 %vm626_vm1, %v501_v7  ;;  %4639 = vmatpush3.msra.mxu1 %v2746_v26 }
 0x13d   : > { %4640 = vmatprep.subr.mxu1 %v2761_v28  ;;  %5141 = vmatprep.mubr.msk.f32.mxu0 %vm626_vm1, %v502_v27  ;;  %v1701_v1 = vadd.f32 %v4996_v30, %v6037_v35  ;;  %v1691_v27 = vadd.f32 %v6143_v20, %v6037_v35  ;;  %v522_v20 = vld [vmem:[%s5598_s26 + $0x520] sm:$0xff] }
 0x13e   : > { %v1695_v31 = vpop.f32.mrf.mxu0  ;;  %4641 = vmatpush3.msra.mxu1 %v2745_v61 }
 0x13f   : > { %4642 = vmatprep.subr.mxu1 %v2760_v9  ;;  %v1696_v18 = vadd.f32 %v6037_v35, %v1695_v31  ;;  %v2791_v28 = vmax.f32 %v1701_v1, 0.0 }
 0x140   : > { %v6165_v36 = vpop.f32.mrf.mxu0  ;;  %5142 = vmatmul.mubr.msk.f32.gmra.mxu0 %vm626_vm1, %v503_v41  ;;  %4643 = vmatpush3.msra.mxu1 %v2744_v23  ;;  %v521_v41 = vld [vmem:[%s5598_s26 + $0x518] sm:$0xff]  ;;  %v1686_v23 = vadd.f32 %v6037_v35, %v6152_v38 }
 0x141   : > { %5144 = vmatprep.mubr.msk.f32.mxu0 %vm626_vm1, %v504_v32  ;;  %3081 = vmatmul.mubr.f32.vlgmr.msra.gmra.mxu1 %v3000_v33  ;;  %v2790_v31 = vmax.f32 %v1696_v18, 0.0  ;;  %v1656_v18 = vadd.f32 %v6037_v35, %v6104_v51 }
 0x142   : > { %v6170_v37 = vpop.f32.mrf.mxu0  ;;  %3150 = vmatprep.mubr.f32.mxu1 %v3003_v34 }
 0x144   : > { %v6173_v40 = vpop.f32.mrf.mxu0  ;;  %5145 = vmatmul.mubr.msk.f32.gmra.mxu0 %vm626_vm1, %v505_v25  ;;  %v1681_v25 = vadd.f32 %v6127_v5, %v6037_v35  ;;  %v524_v5 = vld [vmem:[%s5598_s26 + $0x530] sm:$0xff] }
 0x145   : > { %5147 = vmatprep.mubr.msk.f32.mxu0 %vm626_vm1, %v506_v57  ;;  %v2789_v57 = vmax.f32 %v1691_v27, 0.0 }
 0x146   : > { %v6178_v42 = vpop.f32.mrf.mxu0 }
 0x148   : > { %v6181_v46 = vpop.f32.mrf.mxu0  ;;  %5148 = vmatmul.mubr.msk.f32.gmra.mxu0 %vm626_vm1, %v507_v19 }
 0x149   : > { %5150 = vmatprep.mubr.msk.f32.mxu0 %vm626_vm1, %v508_v44 }
 0x14a   : > { %v6186_v50 = vpop.f32.mrf.mxu0 }
 0x14b   : > { %v1726_v51 = vadd.f32 %v6037_v35, %v6186_v50  ;;  %v1641_v50 = vadd.f32 %v6064_v12, %v6037_v35 }
 0x14c   : > { %v6189_v52 = vpop.f32.mrf.mxu0  ;;  %5151 = vmatmul.mubr.msk.f32.gmra.mxu0 %vm626_vm1, %v509_v48  ;;  %v523_v48 = vld [vmem:[%s5598_s26 + $0x528] sm:$0xff] }
 0x14d   : > { %5153 = vmatprep.mubr.msk.f32.mxu0 %vm626_vm1, %v510_v21  ;;  %v1676_v21 = vadd.f32 %v6037_v35, %v6136_v43 }
 0x14e   : > { %v6194_v56 = vpop.f32.mrf.mxu0 }
 0x150   : > { %v5011_v60 = vpop.f32.mrf.mxu0  ;;  %5154 = vmatmul.mubr.msk.f32.gmra.mxu0 %vm626_vm1, %v511_v53  ;;  %v2788_v53 = vmax.f32 %v1686_v23, 0.0  ;;  %v1721_v23 = vadd.f32 %v6173_v40, %v6037_v35  ;;  %v531_v40 = vld [vmem:[%s5598_s26 + $0x568] sm:$0xff] }
 0x151   : > { %5156 = vmatprep.mubr.msk.f32.mxu0 %vm626_vm1, %v512_v15 }
 0x152   : > { %v6200_v0 = vpop.f32.mrf.mxu0 }
 0x153   : > { %v1746_v43 = vadd.f32 %v6037_v35, %v6200_v0  ;;  %v1661_v0 = vadd.f32 %v6095_v39, %v6037_v35 }
 0x154   : > { %v5014_v3 = vpop.f32.mrf.mxu0  ;;  %5157 = vmatmul.mubr.msk.f32.gmra.mxu0 %vm626_vm1, %v513_v62  ;;  %v1751_v62 = vadd.f32 %v5011_v60, %v6037_v35  ;;  %v525_v60 = vld [vmem:[%s5598_s26 + $0x538] sm:$0xff] }
 0x155   : > { %5159 = vmatprep.mubr.msk.f32.mxu0 %vm626_vm1, %v514_v2  ;;  %v1761_v33 = vadd.f32 %v5014_v3, %v6037_v35  ;;  %v1671_v3 = vadd.f32 %v6111_v54, %v6037_v35 }
 0x156   : > { %v1755_v63 = vpop.f32.mrf.mxu0  ;;  %v2801_v1 = vmax.f32 %v1751_v62, 0.0  ;;  %v1626_v62 = vadd.f32 %v6037_v35, %v6058_v4  ;;  %v535_v4 = vld [vmem:[%s5598_s26 + $0x588] sm:$0xff] }
 0x157   : > { %v1756_v38 = vadd.f32 %v6037_v35, %v1755_v63  ;;  %v2803_v2 = vmax.f32 %v1761_v33, 0.0 }
 0x158   : > { %v5017_v6 = vpop.f32.mrf.mxu0  ;;  %5160 = vmatmul.mubr.msk.f32.gmra.mxu0 %vm626_vm1, %v515_v17  ;;  %v2787_v17 = vmax.f32 %v1681_v25, 0.0  ;;  %v1636_v25 = vadd.f32 %v6037_v35, %v6072_v22  ;;  %v1706_v22 = vadd.f32 %v6037_v35, %v6170_v37 }
 0x159   : > { %5162 = vmatprep.mubr.msk.f32.mxu0 %vm626_vm1, %v516_v49  ;;  %v1771_v7 = vadd.f32 %v5017_v6, %v6037_v35  ;;  %v2802_v49 = vmax.f32 %v1756_v38, 0.0  ;;  %v1666_v6 = vadd.f32 %v6037_v35, %v6120_v47  ;;  %v1736_v47 = vadd.f32 %v6037_v35, %v6194_v56  ;;  %v532_v38 = vld [vmem:[%s5598_s26 + $0x570] sm:$0xff] }
 0x15a   : > { %v1765_v8 = vpop.f32.mrf.mxu0  ;;  %v1651_v56 = vadd.f32 %v6079_v29, %v6037_v35  ;;  %v2792_v37 = vmax.f32 %v1706_v22, 0.0 }
 0x15b   : > { %v1766_v30 = vadd.f32 %v6037_v35, %v1765_v8  ;;  %v2805_v34 = vmax.f32 %v1771_v7, 0.0  ;;  %v526_v8 = vld [vmem:[%s5598_s26 + $0x540] sm:$0xff]  ;;  %v1731_v7 = vadd.f32 %v6181_v46, %v6037_v35  ;;  %v529_v46 = vld [vmem:[%s5598_s26 + $0x558] sm:$0xff] }
 0x15c   : > { %v5020_v14 = vpop.f32.mrf.mxu0  ;;  %5163 = vmatmul.mubr.msk.f32.gmra.mxu0 %vm626_vm1, %v517_v11  ;;  %v2786_v11 = vmax.f32 %v1676_v21, 0.0  ;;  %v2779_v21 = vmax.f32 %v1641_v50, 0.0  ;;  %v547_v50 = vld [vmem:[%s5598_s26 + $0x5e8] sm:$0xff] }
 0x15d   : > { %v1781_v16 = vadd.f32 %v5020_v14, %v6037_v35  ;;  %5165 = vmatprep.mubr.msk.f32.mxu0 %vm626_vm1, %v518_v10  ;;  %v2804_v44 = vmax.f32 %v1766_v30, 0.0  ;;  %v1741_v10 = vadd.f32 %v6189_v52, %v6037_v35  ;;  %v2785_v14 = vmax.f32 %v1671_v3, 0.0  ;;  %v527_v52 = vld [vmem:[%s5598_s26 + $0x548] sm:$0xff]  ;;  %v534_v3 = vld [vmem:[%s5598_s26 + $0x580] sm:$0xff] }
 0x15e   : > { %v1775_v45 = vpop.f32.mrf.mxu0  ;;  %v1646_v30 = vadd.f32 %v6037_v35, %v6088_v55  ;;  %v1716_v55 = vadd.f32 %v6037_v35, %v6178_v42  ;;  %v1631_v42 = vadd.f32 %v6050_v58, %v6037_v35 }
 0x15f   : > { %v2807_v24 = vmax.f32 %v1781_v16, 0.0  ;;  %v1776_v26 = vadd.f32 %v6037_v35, %v1775_v45  ;;  %v2784_v45 = vmax.f32 %v1666_v6, 0.0 }
 0x160   : > { %v6222_v61 = vpop.f32.mrf.mxu0  ;;  %5166 = vmatmul.mubr.msk.f32.gmra.mxu0 %vm626_vm1, %v519_v13  ;;  %v2800_v13 = vmax.f32 %v1746_v43, 0.0  ;;  %v2777_v43 = vmax.f32 %v1631_v42, 0.0  ;;  %v551_v42 = vld [vmem:[%s5598_s26 + $0x608] sm:$0xff] }
 0x161   : > { %v2806_v9 = vmax.f32 %v1776_v26, 0.0  ;;  %4647 = vmatprep.subr.mxu1 %v2807_v24  ;;  %5168 = vmatprep.mubr.msk.f32.mxu0 %vm626_vm1, %v520_v59  ;;  %v528_v59 = vld [vmem:[%s5598_s26 + $0x550] sm:$0xff]  ;;  %v2799_v24 = vmax.f32 %v1741_v10, 0.0  ;;  %v2783_v26 = vmax.f32 %v1661_v0, 0.0  ;;  %v3005_v10 = vld [vmem:[%s7122_s1 + $0x28] sm:$0xff]  ;;  %v537_v0 = vld [vmem:[%s5598_s26 + $0x598] sm:$0xff] }
 0x162   : > { %v6230_v32 = vpop.f32.mrf.mxu0  ;;  %4648 = vmatpush3.msra.mxu1 %v2791_v28  ;;  %v2798_v28 = vmax.f32 %v1736_v47, 0.0  ;;  %v538_v47 = vld [vmem:[%s5598_s26 + $0x5a0] sm:$0xff] }
 0x163   : > { %4649 = vmatprep.subr.mxu1 %v2806_v9  ;;  %v2782_v9 = vmax.f32 %v1656_v18, 0.0 }
 0x164   : > { %v6236_v19 = vpop.f32.mrf.mxu0  ;;  %5169 = vmatmul.mubr.msk.f32.gmra.mxu0 %vm626_vm1, %v521_v41  ;;  %4650 = vmatpush3.msra.mxu1 %v2790_v31  ;;  %v530_v41 = vld [vmem:[%s5598_s26 + $0x560] sm:$0xff]  ;;  %v2797_v31 = vmax.f32 %v1731_v7, 0.0  ;;  %v541_v7 = vld [vmem:[%s5598_s26 + $0x5b8] sm:$0xff] }
 0x165   : > { %4651 = vmatprep.subr.mxu1 %v2805_v34  ;;  %5171 = vmatprep.mubr.msk.f32.mxu0 %vm626_vm1, %v522_v20  ;;  %v2781_v20 = vmax.f32 %v1651_v56, 0.0  ;;  %v2796_v34 = vmax.f32 %v1726_v51, 0.0  ;;  %v542_v56 = vld [vmem:[%s5598_s26 + $0x5c0] sm:$0xff]  ;;  %v543_v51 = vld [vmem:[%s5598_s26 + $0x5c8] sm:$0xff] }
 0x166   : > { %v6244_v15 = vpop.f32.mrf.mxu0  ;;  %4652 = vmatpush3.msra.mxu1 %v2789_v57  ;;  %v2780_v57 = vmax.f32 %v1646_v30, 0.0 }
 0x167   : > { %4653 = vmatprep.subr.mxu1 %v2804_v44  ;;  %v1711_v44 = vadd.f32 %v6165_v36, %v6037_v35  ;;  %v533_v36 = vld [vmem:[%s5598_s26 + $0x578] sm:$0xff] }
 0x168   : > { %v6250_v63 = vpop.f32.mrf.mxu0  ;;  %5172 = vmatmul.mubr.msk.f32.gmra.mxu0 %vm626_vm1, %v523_v48  ;;  %4654 = vmatpush3.msra.mxu1 %v2788_v53  ;;  %v2795_v48 = vmax.f32 %v1721_v23, 0.0  ;;  %v546_v23 = vld [vmem:[%s5598_s26 + $0x5e0] sm:$0xff] }
 0x169   : > { %4655 = vmatprep.subr.mxu1 %v2803_v2  ;;  %5174 = vmatprep.mubr.msk.f32.mxu0 %vm626_vm1, %v524_v5  ;;  %v2794_v5 = vmax.f32 %v1716_v55, 0.0  ;;  %v2778_v2 = vmax.f32 %v1636_v25, 0.0  ;;  %v548_v55 = vld [vmem:[%s5598_s26 + $0x5f0] sm:$0xff] }
 0x16a   : > { %v6259_v54 = vpop.f32.mrf.mxu0  ;;  %4656 = vmatpush3.msra.mxu1 %v2787_v17  ;;  %v2793_v17 = vmax.f32 %v1711_v44, 0.0 }
 0x16b   : > { %4657 = vmatprep.subr.mxu1 %v2802_v49 }
 0x16c   : > { %v6266_v16 = vpop.f32.mrf.mxu0  ;;  %5175 = vmatmul.mubr.msk.f32.gmra.mxu0 %vm626_vm1, %v525_v60  ;;  %4658 = vmatpush3.msra.mxu1 %v2786_v11  ;;  %v2776_v60 = vmax.f32 %v1626_v62, 0.0  ;;  %v536_v11 = vld [vmem:[%s5598_s26 + $0x590] sm:$0xff] }
 0x16d   : > { %4659 = vmatprep.subr.mxu1 %v2801_v1  ;;  %5177 = vmatprep.mubr.msk.f32.mxu0 %vm626_vm1, %v526_v8  ;;  %v3002_v8 = vld [vmem:[%s7122_s1 + $0x10] sm:$0xff] }
 0x16e   : > { %v6275_v39 = vpop.f32.mrf.mxu0  ;;  %4660 = vmatpush3.msra.mxu1 %v2785_v14 }
 0x16f   : > { %4661 = vmatprep.subr.mxu1 %v2800_v13 }
 0x170   : > { %v6282_v27 = vpop.f32.mrf.mxu0  ;;  %5178 = vmatmul.mubr.msk.f32.gmra.mxu0 %vm626_vm1, %v527_v52  ;;  %4662 = vmatpush3.msra.mxu1 %v2784_v45  ;;  %v539_v52 = vld [vmem:[%s5598_s26 + $0x5a8] sm:$0xff]  ;;  %v540_v45 = vld [vmem:[%s5598_s26 + $0x5b0] sm:$0xff] }
 0x171   : > { %4663 = vmatprep.subr.mxu1 %v2799_v24  ;;  %5180 = vmatprep.mubr.msk.f32.mxu0 %vm626_vm1, %v528_v59 }
 0x172   : > { %v6291_v29 = vpop.f32.mrf.mxu0  ;;  %4664 = vmatpush3.msra.mxu1 %v2783_v26 }
 0x173   : > { %4665 = vmatprep.subr.mxu1 %v2798_v28 }
 0x174   : > { %v6298_v33 = vpop.f32.mrf.mxu0  ;;  %5181 = vmatmul.mubr.msk.f32.gmra.mxu0 %vm626_vm1, %v529_v46  ;;  %4666 = vmatpush3.msra.mxu1 %v2782_v9  ;;  %v544_v46 = vld [vmem:[%s5598_s26 + $0x5d0] sm:$0xff]  ;;  %v545_v9 = vld [vmem:[%s5598_s26 + $0x5d8] sm:$0xff] }
 0x175   : > { %4667 = vmatprep.subr.mxu1 %v2797_v31  ;;  %5183 = vmatprep.mubr.msk.f32.mxu0 %vm626_vm1, %v530_v41 }
 0x176   : > { %v6307_v12 = vpop.f32.mrf.mxu0  ;;  %4668 = vmatpush3.msra.mxu1 %v2781_v20 }
 0x177   : > { %4669 = vmatprep.subr.mxu1 %v2796_v34 }
 0x178   : > { %v6314_v53 = vpop.f32.mrf.mxu0  ;;  %5184 = vmatmul.mubr.msk.f32.gmra.mxu0 %vm626_vm1, %v531_v40  ;;  %4670 = vmatpush3.msra.mxu1 %v2780_v57  ;;  %v549_v40 = vld [vmem:[%s5598_s26 + $0x5f8] sm:$0xff]  ;;  %v550_v57 = vld [vmem:[%s5598_s26 + $0x600] sm:$0xff]  ;;  %s350_s26 = sand.u32 1, %s5465_s14  }
 0x179   : > { %4671 = vmatprep.subr.mxu1 %v2795_v48  ;;  %5186 = vmatprep.mubr.msk.f32.mxu0 %vm626_vm1, %v532_v38  ;;  %s4077_s11 = sshll.u32 %s350_s26, 3  ;;  %s4001_s30 = scalar_lea.sflag [#allocation3], %s350_s26 }
 0x17a   : > { %v6323_v58 = vpop.f32.mrf.mxu0  ;;  %4672 = vmatpush3.msra.mxu1 %v2779_v21  ;;  %s352_s21 = scalar_lea.vmem [#allocation2], %s4077_s11  ;;  %s5417_s11 = sshll.u32 %s5477_s17, 4  ;;  %s5418_s11 = int_to_ptr.vmem [resolvable:$false] %s5417_s11 }
 0x17b   : > { %4673 = vmatprep.subr.mxu1 %v2794_v5  ;;  %s4014_s25 = sshll.u32 %s352_s21, 4  ;;  %s5419_s12 = scalar_lea.vmem %s5418_s11, 256  ;;  %s4015_s25 = int_to_ptr.vmem [resolvable:$true] %s4014_s25 }
 0x17c   : > { %v5044_v49 = vpop.f32.mrf.mxu0  ;;  %5187 = vmatmul.mubr.msk.f32.gmra.mxu0 %vm626_vm1, %v533_v36  ;;  %4674 = vmatpush3.msra.mxu1 %v2778_v2  ;;  %v1851_v2 = vadd.f32 %v6314_v53, %v6037_v35  ;;  %v1841_v53 = vadd.f32 %v6298_v33, %v6037_v35  ;;  %v1831_v33 = vadd.f32 %v6282_v27, %v6037_v35  ;;  %s5413_s0 = scalar_lea.vmem %s4015_s25, 128  ;;  %p5420_p0 = scmp.lt.s32.totalorder %s4015_s25, %s5418_s11 }
 0x17d   : > { %4675 = vmatprep.subr.mxu1 %v2793_v17  ;;  %5189 = vmatprep.mubr.msk.f32.mxu0 %vm626_vm1, %v534_v3  ;;  %v1861_v38 = vadd.f32 %v5044_v49, %v6037_v35  ;;  %p5414_p11 = scmp.ne.s32.totalorder %s4015_s25, %s5413_s0  ;;  %p5421_p1 = scmp.lt.s32.totalorder %s5419_s12, %s5413_s0 }
 0x17e   : > { %v1855_v6 = vpop.f32.mrf.mxu0  ;;  %4676 = vmatpush3.msra.mxu1 %v2777_v43 }
 0x17f   : > { %4677 = vmatprep.subr.mxu1 %v2792_v37  ;;  %v1856_v21 = vadd.f32 %v6037_v35, %v1855_v6  ;;  %v2823_v3 = vmax.f32 %v1861_v38, 0.0  ;;  %v1846_v37 = vadd.f32 %v6037_v35, %v6323_v58  ;;  %v1836_v58 = vadd.f32 %v6037_v35, %v6307_v12  ;;  %p5415_p12 = pnand %p5414_p11, %p5571_p5  ;;  %p5422_p2 = por %p5421_p1, %p5420_p0 }
 0x180   : > { %v6336_v1 = vpop.f32.mrf.mxu0  ;;  %5190 = vmatmul.mubr.msk.f32.gmra.mxu0 %vm626_vm1, %v535_v4  ;;  %4678 = vmatpush3.msra.mxu1 %v2776_v60 }
 0x181   : > { %5192 = vmatprep.mubr.msk.f32.mxu0 %vm626_vm1, %v536_v11  ;;  %3151 = vmatmul.mubr.f32.vlgmr.msra.gmra.mxu1 %v3002_v8  ;;  %v2822_v4 = vmax.f32 %v1856_v21, 0.0  ;;  %v2821_v8 = vmax.f32 %v1851_v2, 0.0  ;;  %v1801_v2 = vadd.f32 %v6236_v19, %v6037_v35  ;;  %v1871_v19 = vadd.f32 %v6336_v1, %v6037_v35  ;;  %p5416_p13 = pneg %p5415_p12 }
 0x182   : > { %v6341_v14 = vpop.f32.mrf.mxu0  ;;  %3220 = vmatprep.mubr.f32.mxu1 %v3005_v10 }
 0x183   : > { %p5423_p3 = pnand %p5422_p2, %p5416_p13 }
 0x184   : > { %v6344_v13 = vpop.f32.mrf.mxu0  ;;  %5193 = vmatmul.mubr.msk.f32.gmra.mxu0 %vm626_vm1, %v537_v0 }
 0x185   : > { %5195 = vmatprep.mubr.msk.f32.mxu0 %vm626_vm1, %v538_v47 }
 0x186   : > { %v6349_v18 = vpop.f32.mrf.mxu0 }
 0x188   : > { %v6352_v59 = vpop.f32.mrf.mxu0  ;;  %5196 = vmatmul.mubr.msk.f32.gmra.mxu0 %vm626_vm1, %v539_v52  ;;  %v2820_v52 = vmax.f32 %v1846_v37, 0.0  ;;  %v1796_v37 = vadd.f32 %v6037_v35, %v6244_v15  ;;  %v1866_v15 = vadd.f32 %v6037_v35, %v6341_v14  ;;  %v3004_v14 = vld [vmem:[%s7122_s1 + $0x20] sm:$0xff] }
 0x189   : > { %5198 = vmatprep.mubr.msk.f32.mxu0 %vm626_vm1, %v540_v45 }
 0x18a   : > { %v6357_v24 = vpop.f32.mrf.mxu0 }
 0x18c   : > { %v6360_v26 = vpop.f32.mrf.mxu0  ;;  %5199 = vmatmul.mubr.msk.f32.gmra.mxu0 %vm626_vm1, %v541_v7 }
 0x18d   : > { %5201 = vmatprep.mubr.msk.f32.mxu0 %vm626_vm1, %v542_v56  ;;  %v1901_v27 = vadd.f32 %v6360_v26, %v6037_v35 }
 0x18e   : > { %v6365_v28 = vpop.f32.mrf.mxu0 }
 0x190   : > { %v5059_v30 = vpop.f32.mrf.mxu0  ;;  %5202 = vmatmul.mubr.msk.f32.gmra.mxu0 %vm626_vm1, %v543_v51  ;;  %v2819_v51 = vmax.f32 %v1841_v53, 0.0  ;;  %v2811_v53 = vmax.f32 %v1801_v2, 0.0 }
 0x191   : > { %5204 = vmatprep.mubr.msk.f32.mxu0 %vm626_vm1, %v544_v46  ;;  %v1911_v7 = vadd.f32 %v5059_v30, %v6037_v35 }
 0x192   : > { %v1905_v41 = vpop.f32.mrf.mxu0 }
 0x194   : > { %v5062_v31 = vpop.f32.mrf.mxu0  ;;  %5205 = vmatmul.mubr.msk.f32.gmra.mxu0 %vm626_vm1, %v545_v9  ;;  %v6413_v9 = vpop.f32.mrf.mxu1 }
 0x195   : > { %5207 = vmatprep.mubr.msk.f32.mxu0 %vm626_vm1, %v546_v23  ;;  %v1921_v6 = vadd.f32 %v5062_v31, %v6037_v35  ;;  %7136 = vst [vmem:[#allocation5_spill] sm:$0xff] %v6413_v9  ;;  %v1906_v23 = vadd.f32 %v6037_v35, %v1905_v41  ;;  %v1826_v31 = vadd.f32 %v6037_v35, %v6291_v29 }
 0x196   : > { %v1915_v20 = vpop.f32.mrf.mxu0  ;;  %v6426_v41 = vpop.f32.mrf.mxu1  ;;  %v1896_v29 = vadd.f32 %v6037_v35, %v6365_v28 }
 0x197   : > { %v1916_v0 = vadd.f32 %v6037_v35, %v1915_v20  ;;  %v2835_v56 = vmax.f32 %v1921_v6, 0.0  ;;  %v2833_v20 = vmax.f32 %v1911_v7, 0.0  ;;  %7137 = vst [vmem:[#allocation6_spill] sm:$0xff] %v6426_v41  ;;  %v2816_v26 = vmax.f32 %v1826_v31, 0.0 }
 0x198   : > { %v5065_v34 = vpop.f32.mrf.mxu0  ;;  %5208 = vmatmul.mubr.msk.f32.gmra.mxu0 %vm626_vm1, %v547_v50  ;;  %v2818_v50 = vmax.f32 %v1836_v58, 0.0  ;;  %v6440_v28 = vpop.f32.mrf.mxu1  ;;  %v2810_v58 = vmax.f32 %v1796_v37, 0.0 }
 0x199   : > { %5210 = vmatprep.mubr.msk.f32.mxu0 %vm626_vm1, %v548_v55  ;;  %v1931_v5 = vadd.f32 %v5065_v34, %v6037_v35  ;;  %v2834_v12 = vmax.f32 %v1916_v0, 0.0  ;;  %v1821_v55 = vadd.f32 %v6266_v16, %v6037_v35  ;;  %v2817_v34 = vmax.f32 %v1831_v33, 0.0  ;;  %7138 = vst [vmem:[#allocation7_spill] sm:$0xff] %v6440_v28 }
 0x19a   : > { %v1925_v25 = vpop.f32.mrf.mxu0  ;;  %v1891_v16 = vadd.f32 %v6352_v59, %v6037_v35  ;;  %v2824_v33 = vmax.f32 %v1866_v15, 0.0 }
 0x19b   : > { %v1926_v43 = vadd.f32 %v6037_v35, %v1925_v25  ;;  %v2837_v11 = vmax.f32 %v1931_v5, 0.0  ;;  %v2832_v25 = vmax.f32 %v1906_v23, 0.0  ;;  %v1806_v5 = vadd.f32 %v6037_v35, %v6259_v54 }
 0x19c   : > { %v5068_v44 = vpop.f32.mrf.mxu0  ;;  %5211 = vmatmul.mubr.msk.f32.gmra.mxu0 %vm626_vm1, %v549_v40  ;;  %v1876_v54 = vadd.f32 %v6037_v35, %v6349_v18 }
 0x19d   : > { %v1941_v48 = vadd.f32 %v5068_v44, %v6037_v35  ;;  %5213 = vmatprep.mubr.msk.f32.mxu0 %vm626_vm1, %v550_v57  ;;  %v2836_v47 = vmax.f32 %v1926_v43, 0.0  ;;  %v1816_v57 = vadd.f32 %v6037_v35, %v6275_v39  ;;  %v2831_v44 = vmax.f32 %v1901_v27, 0.0 }
 0x19e   : > { %v1935_v22 = vpop.f32.mrf.mxu0  ;;  %v1886_v39 = vadd.f32 %v6037_v35, %v6357_v24  ;;  %v6454_v24 = vpop.f32.mrf.mxu1  ;;  %v2826_v0 = vmax.f32 %v1876_v54, 0.0 }
 0x19f   : > { %v2839_v36 = vmax.f32 %v1941_v48, 0.0  ;;  %v1936_v62 = vadd.f32 %v6037_v35, %v1935_v22  ;;  %v1811_v48 = vadd.f32 %v6250_v63, %v6037_v35  ;;  %v2830_v22 = vmax.f32 %v1896_v29, 0.0  ;;  %7139 = vst [vmem:[#allocation8_spill] sm:$0xff] %v6454_v24 }
 0x1a0   : > { %v6390_v17 = vpop.f32.mrf.mxu0  ;;  %5214 = vmatmul.mubr.msk.f32.gmra.mxu0 %vm626_vm1, %v551_v42  ;;  %v2815_v42 = vmax.f32 %v1821_v55, 0.0  ;;  %v2814_v59 = vmax.f32 %v1816_v57, 0.0  ;;  %v1881_v63 = vadd.f32 %v6344_v13, %v6037_v35  ;;  %v2812_v13 = vmax.f32 %v1806_v5, 0.0  ;;  %v6466_v18 = vpop.f32.mrf.mxu1 }
 0x1a1   : > { %v2838_v49 = vmax.f32 %v1936_v62, 0.0  ;;  %4682 = vmatprep.subr.mxu1 %v2839_v36  ;;  %v2829_v62 = vmax.f32 %v1891_v16, 0.0 }
 0x1a2   : > { %v6396_v60 = vpop.f32.mrf.mxu0  ;;  %4683 = vmatpush3.msra.mxu1 %v2823_v3  ;;  %v2813_v3 = vmax.f32 %v1811_v48, 0.0  ;;  %v2827_v6 = vmax.f32 %v1881_v63, 0.0 }
 0x1a3   : > { %4684 = vmatprep.subr.mxu1 %v2838_v49  ;;  %v2828_v49 = vmax.f32 %v1886_v39, 0.0 }
 0x1a4   : > { %v6401_v10 = vpop.f32.mrf.mxu0  ;;  %4685 = vmatpush3.msra.mxu1 %v2822_v4 }
 0x1a5   : > { %4686 = vmatprep.subr.mxu1 %v2837_v11  ;;  %v1791_v11 = vadd.f32 %v6222_v61, %v6037_v35 }
 0x1a6   : > { %v6406_v45 = vpop.f32.mrf.mxu0  ;;  %4687 = vmatpush3.msra.mxu1 %v2821_v8 }
 0x1a7   : > { %4688 = vmatprep.subr.mxu1 %v2836_v47  ;;  %v1786_v47 = vadd.f32 %v6037_v35, %v6230_v32  ;;  %v2809_v7 = vmax.f32 %v1791_v11, 0.0  ;;  %v3007_v35 = vld [vmem:[%s7122_s1 + $0x38] sm:$0xff] }
 0x1a8   : > { %v6411_v46 = vpop.f32.mrf.mxu0  ;;  %4689 = vmatpush3.msra.mxu1 %v2820_v52  ;;  %v2825_v52 = vmax.f32 %v1871_v19, 0.0 }
 0x1a9   : > { %4690 = vmatprep.subr.mxu1 %v2835_v56  ;;  %v6472_v56 = vpop.f32.mrf.mxu1 }
 0x1aa   : > { %v6418_v30 = vpop.f32.mrf.mxu0  ;;  %4691 = vmatpush3.msra.mxu1 %v2819_v51  ;;  %7140 = vst [vmem:[#allocation9_spill] sm:$0xff] %v6472_v56  ;;  %v2808_v51 = vmax.f32 %v1786_v47, 0.0 }
 0x1ab   : > { %4692 = vmatprep.subr.mxu1 %v2834_v12  ;;  %v6482_v12 = vpop.f32.mrf.mxu1 }
 0x1ac   : > { %v6424_v40 = vpop.f32.mrf.mxu0  ;;  %4693 = vmatpush3.msra.mxu1 %v2818_v50 }
 0x1ad   : > { %4694 = vmatprep.subr.mxu1 %v2833_v20  ;;  %v6488_v27 = vpop.f32.mrf.mxu1 }
 0x1ae   : > { %v6432_v38 = vpop.f32.mrf.mxu0  ;;  %4695 = vmatpush3.msra.mxu1 %v2817_v34 }
 0x1af   : > { %4696 = vmatprep.subr.mxu1 %v2832_v25  ;;  %v6494_v34 = vpop.f32.mrf.mxu1 }
 0x1b0   : > { %v6438_v21 = vpop.f32.mrf.mxu0  ;;  %4697 = vmatpush3.msra.mxu1 %v2816_v26 }
 0x1b1   : > { %4698 = vmatprep.subr.mxu1 %v2831_v44  ;;  %v6500_v57 = vpop.f32.mrf.mxu1 }
 0x1b2   : > { %v6446_v36 = vpop.f32.mrf.mxu0  ;;  %4699 = vmatpush3.msra.mxu1 %v2815_v42 }
 0x1b3   : > { %4700 = vmatprep.subr.mxu1 %v2830_v22  ;;  %v6504_v44 = vpop.f32.mrf.mxu1 }
 0x1b4   : > { %v6452_v43 = vpop.f32.mrf.mxu0  ;;  %4701 = vmatpush3.msra.mxu1 %v2814_v59 }
 0x1b5   : > { %4702 = vmatprep.subr.mxu1 %v2829_v62  ;;  %v6506_v39 = vpop.f32.mrf.mxu1  ;;  %v6513_v62 = vld [vmem:[%s7124_s3] ss:$0 sm:$0xff] }
 0x1b6   : > { %v6460_v4 = vpop.f32.mrf.mxu0  ;;  %4703 = vmatpush3.msra.mxu1 %v2813_v3 }
 0x1b7   : > { %4704 = vmatprep.subr.mxu1 %v2828_v49  ;;  %v6508_v59 = vpop.f32.mrf.mxu1 }
 0x1b8   : > { %v5089_v8 = vpop.f32.mrf.mxu0  ;;  %4705 = vmatpush3.msra.mxu1 %v2812_v13 }
 0x1b9   : > { %4706 = vmatprep.subr.mxu1 %v2827_v6  ;;  %v6516_v54 = vpop.f32.mrf.mxu1 }
 0x1ba   : > { %v2005_v1 = vpop.f32.mrf.mxu0  ;;  %4707 = vmatpush3.msra.mxu1 %v2811_v53  ;;  %v2011_v53 = vadd.f32 %v6513_v62, %v5089_v8  ;;  %v2001_v8 = vadd.f32 %v6513_v62, %v6452_v43 }
 0x1bb   : > { %4708 = vmatprep.subr.mxu1 %v2826_v0  ;;  %v6525_v47 = vpop.f32.mrf.mxu1 }
 0x1bc   : > { %v5092_v61 = vpop.f32.mrf.mxu0  ;;  %4709 = vmatpush3.msra.mxu1 %v2810_v58  ;;  %7141 = vst [vmem:[#allocation10_spill] sm:$0xff] %v6525_v47 }
 0x1bd   : > { %4710 = vmatprep.subr.mxu1 %v2825_v52  ;;  %v2021_v2 = vadd.f32 %v6513_v62, %v5092_v61 }
 0x1be   : > { %v2015_v23 = vpop.f32.mrf.mxu0  ;;  %4711 = vmatpush3.msra.mxu1 %v2809_v7  ;;  %v2006_v7 = vadd.f32 %v6513_v62, %v2005_v1 }
 0x1bf   : > { %4712 = vmatprep.subr.mxu1 %v2824_v33  ;;  %v2016_v37 = vadd.f32 %v6513_v62, %v2015_v23  ;;  %v2855_v15 = vmax.f32 %v2021_v2, 0.0  ;;  %v1996_v2 = vadd.f32 %v6513_v62, %v6460_v4 }
 0x1c0   : > { %v6480_v32 = vpop.f32.mrf.mxu0  ;;  %4713 = vmatpush3.msra.mxu1 %v2808_v51 }
 0x1c1   : > { %3221 = vmatmul.mubr.f32.vlgmr.msra.gmra.mxu1 %v3004_v14  ;;  %v2854_v61 = vmax.f32 %v2016_v37, 0.0  ;;  %v2853_v14 = vmax.f32 %v2011_v53, 0.0  ;;  %v1991_v37 = vadd.f32 %v6513_v62, %v6438_v21  ;;  %v2850_v53 = vmax.f32 %v1996_v2, 0.0 }
 0x1c2   : > { %v6484_v31 = vpop.f32.mrf.mxu0  ;;  %3290 = vmatprep.mubr.f32.mxu1 %v3007_v35 }
 0x1c4   : > { %v6486_v50 = vpop.f32.mrf.mxu0 }
 0x1c6   : > { %v6490_v20 = vpop.f32.mrf.mxu0 }
 0x1c8   : > { %v6492_v55 = vpop.f32.mrf.mxu0 }
 0x1ca   : > { %v6496_v29 = vpop.f32.mrf.mxu0 }
 0x1cc   : > { %v6498_v25 = vpop.f32.mrf.mxu0 }
 0x1cd   : > { %v2061_v21 = vadd.f32 %v6513_v62, %v6498_v25 }
 0x1ce   : > { %v6502_v26 = vpop.f32.mrf.mxu0 }
 0x1d0   : > { %v5107_v16 = vpop.f32.mrf.mxu0 }
 0x1d2   : > { %v2065_v48 = vpop.f32.mrf.mxu0 }
 0x1d4   : > { %v5110_v42 = vpop.f32.mrf.mxu0 }
 0x1d5   : > { %v2081_v51 = vadd.f32 %v6513_v62, %v5110_v42 }
 0x1d6   : > { %v2075_v22 = vpop.f32.mrf.mxu0 }
 0x1d7   : > { %v2867_v43 = vmax.f32 %v2081_v51, 0.0  ;;  %v1976_v51 = vadd.f32 %v6513_v62, %v6432_v38  ;;  %v2046_v38 = vadd.f32 %v6513_v62, %v6496_v29 }
 0x1d8   : > { %v5113_v5 = vpop.f32.mrf.mxu0 }
 0x1d9   : > { %v2091_v19 = vadd.f32 %v6513_v62, %v5113_v5  ;;  %v6536_v5 = vpop.f32.mrf.mxu1 }
 0x1da   : > { %v2085_v63 = vpop.f32.mrf.mxu0  ;;  %7142 = vst [vmem:[#allocation11_spill] sm:$0xff] %v6536_v5 }
 0x1db   : > { %v2086_v58 = vadd.f32 %v6513_v62, %v2085_v63  ;;  %v2869_v23 = vmax.f32 %v2091_v19, 0.0  ;;  %v2076_v63 = vadd.f32 %v6513_v62, %v2075_v22  ;;  %v6548_v22 = vpop.f32.mrf.mxu1 }
 0x1dc   : > { %v5116_v3 = vpop.f32.mrf.mxu0  ;;  %7143 = vst [vmem:[#allocation12_spill] sm:$0xff] %v6548_v22 }
 0x1dd   : > { %v2101_v49 = vadd.f32 %v6513_v62, %v5116_v3  ;;  %v2868_v1 = vmax.f32 %v2086_v58, 0.0  ;;  %v2852_v3 = vmax.f32 %v2006_v7, 0.0  ;;  %v2866_v4 = vmax.f32 %v2076_v63, 0.0 }
 0x1de   : > { %v2095_v13 = vpop.f32.mrf.mxu0  ;;  %v1981_v58 = vadd.f32 %v6513_v62, %v6424_v40  ;;  %v2051_v40 = vadd.f32 %v6513_v62, %v6492_v55  ;;  %v2846_v55 = vmax.f32 %v1976_v51, 0.0 }
 0x1df   : > { %v2871_v6 = vmax.f32 %v2101_v49, 0.0  ;;  %v2096_v11 = vadd.f32 %v6513_v62, %v2095_v13  ;;  %v2071_v49 = vadd.f32 %v6513_v62, %v5107_v16  ;;  %v2851_v13 = vmax.f32 %v2001_v8, 0.0 }
 0x1e0   : > { %v6523_v0 = vpop.f32.mrf.mxu0  ;;  %v2863_v8 = vmax.f32 %v2061_v21, 0.0  ;;  %v2847_v63 = vmax.f32 %v1981_v58, 0.0 }
 0x1e1   : > { %v2870_v52 = vmax.f32 %v2096_v11, 0.0  ;;  %4717 = vmatprep.subr.mxu1 %v2871_v6  ;;  %v2066_v6 = vadd.f32 %v6513_v62, %v2065_v48  ;;  %v1986_v11 = vadd.f32 %v6513_v62, %v6446_v36  ;;  %v6561_v48 = vpop.f32.mrf.mxu1  ;;  %v2056_v36 = vadd.f32 %v6513_v62, %v6502_v26 }
 0x1e2   : > { %v6529_v33 = vpop.f32.mrf.mxu0  ;;  %4718 = vmatpush3.msra.mxu1 %v2855_v15  ;;  %v2865_v15 = vmax.f32 %v2071_v49, 0.0  ;;  %7144 = vst [vmem:[#allocation13_spill] sm:$0xff] %v6561_v48 }
 0x1e3   : > { %4719 = vmatprep.subr.mxu1 %v2870_v52  ;;  %v2849_v52 = vmax.f32 %v1991_v37, 0.0  ;;  %v2848_v25 = vmax.f32 %v1986_v11, 0.0  ;;  %v6575_v26 = vpop.f32.mrf.mxu1  ;;  %v2862_v2 = vmax.f32 %v2056_v36, 0.0  ;;  %v1961_v37 = vadd.f32 %v6513_v62, %v6401_v10 }
 0x1e4   : > { %v6534_v35 = vpop.f32.mrf.mxu0  ;;  %4720 = vmatpush3.msra.mxu1 %v2854_v61  ;;  %v2864_v61 = vmax.f32 %v2066_v6, 0.0  ;;  %7145 = vst [vmem:[#allocation14_spill] sm:$0xff] %v6575_v26  ;;  %v1956_v11 = vadd.f32 %v6513_v62, %v6406_v45  ;;  %v2031_v10 = vadd.f32 %v6513_v62, %v6480_v32  ;;  %v2026_v45 = vadd.f32 %v6513_v62, %v6484_v31  ;;  %v3006_v31 = vld [vmem:[%s7122_s1 + $0x30] sm:$0xff] }
 0x1e5   : > { %4721 = vmatprep.subr.mxu1 %v2869_v23  ;;  %v6589_v29 = vpop.f32.mrf.mxu1  ;;  %v2843_v58 = vmax.f32 %v1961_v37, 0.0 }
 0x1e6   : > { %v6541_v42 = vpop.f32.mrf.mxu0  ;;  %4722 = vmatpush3.msra.mxu1 %v2853_v14  ;;  %v1971_v14 = vadd.f32 %v6513_v62, %v6411_v46  ;;  %v2041_v46 = vadd.f32 %v6513_v62, %v6486_v50  ;;  %7146 = vst [vmem:[#allocation15_spill] sm:$0xff] %v6589_v29  ;;  %v2842_v51 = vmax.f32 %v1956_v11, 0.0 }
 0x1e7   : > { %4723 = vmatprep.subr.mxu1 %v2868_v1 }
 0x1e8   : > { %v6546_v19 = vpop.f32.mrf.mxu0  ;;  %4724 = vmatpush3.msra.mxu1 %v2852_v3  ;;  %v1966_v3 = vadd.f32 %v6513_v62, %v6418_v30  ;;  %v2036_v30 = vadd.f32 %v6513_v62, %v6490_v20  ;;  %v2859_v21 = vmax.f32 %v2041_v46, 0.0  ;;  %v6601_v20 = vpop.f32.mrf.mxu1 }
 0x1e9   : > { %4725 = vmatprep.subr.mxu1 %v2867_v43  ;;  %v2861_v43 = vmax.f32 %v2051_v40, 0.0 }
 0x1ea   : > { %v6553_v16 = vpop.f32.mrf.mxu0  ;;  %4726 = vmatpush3.msra.mxu1 %v2851_v13  ;;  %v2845_v13 = vmax.f32 %v1971_v14, 0.0  ;;  %v2844_v50 = vmax.f32 %v1966_v3, 0.0  ;;  %v2858_v36 = vmax.f32 %v2036_v30, 0.0  ;;  %v2856_v14 = vmax.f32 %v2026_v45, 0.0 }
 0x1eb   : > { %4727 = vmatprep.subr.mxu1 %v2866_v4  ;;  %v2860_v4 = vmax.f32 %v2046_v38, 0.0 }
 0x1ec   : > { %v6559_v7 = vpop.f32.mrf.mxu0  ;;  %4728 = vmatpush3.msra.mxu1 %v2850_v53 }
 0x1ed   : > { %4729 = vmatprep.subr.mxu1 %v2865_v15  ;;  %v1951_v15 = vadd.f32 %v6513_v62, %v6390_v17 }
 0x1ee   : > { %v6567_v23 = vpop.f32.mrf.mxu0  ;;  %4730 = vmatpush3.msra.mxu1 %v2849_v52 }
 0x1ef   : > { %4731 = vmatprep.subr.mxu1 %v2864_v61  ;;  %v1946_v61 = vadd.f32 %v6513_v62, %v6396_v60  ;;  %v2841_v40 = vmax.f32 %v1951_v15, 0.0  ;;  %v3009_v60 = vld [vmem:[%s7122_s1 + $0x48] sm:$0xff] }
 0x1f0   : > { %v6573_v1 = vpop.f32.mrf.mxu0  ;;  %4732 = vmatpush3.msra.mxu1 %v2848_v25  ;;  %v2857_v25 = vmax.f32 %v2031_v10, 0.0 }
 0x1f1   : > { %4733 = vmatprep.subr.mxu1 %v2863_v8  ;;  %v6607_v8 = vpop.f32.mrf.mxu1 }
 0x1f2   : > { %v6581_v49 = vpop.f32.mrf.mxu0  ;;  %4734 = vmatpush3.msra.mxu1 %v2847_v63  ;;  %v2840_v63 = vmax.f32 %v1946_v61, 0.0 }
 0x1f3   : > { %4735 = vmatprep.subr.mxu1 %v2862_v2  ;;  %v6617_v3 = vpop.f32.mrf.mxu1 }
 0x1f4   : > { %v6587_v6 = vpop.f32.mrf.mxu0  ;;  %4736 = vmatpush3.msra.mxu1 %v2846_v55 }
 0x1f5   : > { %4737 = vmatprep.subr.mxu1 %v2861_v43  ;;  %v6623_v43 = vpop.f32.mrf.mxu1 }
 0x1f6   : > { %v6595_v53 = vpop.f32.mrf.mxu0  ;;  %4738 = vmatpush3.msra.mxu1 %v2845_v13 }
 0x1f7   : > { %4739 = vmatprep.subr.mxu1 %v2860_v4  ;;  %v6629_v30 = vpop.f32.mrf.mxu1 }
 0x1f8   : > { %v5137_v52 = vpop.f32.mrf.mxu0  ;;  %4740 = vmatpush3.msra.mxu1 %v2844_v50 }
 0x1f9   : > { %4741 = vmatprep.subr.mxu1 %v2859_v21  ;;  %v6633_v50 = vpop.f32.mrf.mxu1  ;;  %v2171_v22 = vadd.f32 %v6513_v62, %v5137_v52  ;;  %v2161_v52 = vadd.f32 %v6513_v62, %v6587_v6 }
 0x1fa   : > { %v2165_v32 = vpop.f32.mrf.mxu0  ;;  %4742 = vmatpush3.msra.mxu1 %v2843_v58 }
 0x1fb   : > { %4743 = vmatprep.subr.mxu1 %v2858_v36  ;;  %v6637_v15 = vpop.f32.mrf.mxu1  ;;  %v2883_v6 = vmax.f32 %v2161_v52, 0.0 }
 0x1fc   : > { %v5140_v17 = vpop.f32.mrf.mxu0  ;;  %4744 = vmatpush3.msra.mxu1 %v2842_v51 }
 0x1fd   : > { %4745 = vmatprep.subr.mxu1 %v2857_v25  ;;  %v6639_v36 = vpop.f32.mrf.mxu1 }
 0x1fe   : > { %v2175_v38 = vpop.f32.mrf.mxu0  ;;  %4746 = vmatpush3.msra.mxu1 %v2841_v40 }
 0x1ff   : > { %4747 = vmatprep.subr.mxu1 %v2856_v14  ;;  %v6641_v25 = vpop.f32.mrf.mxu1  ;;  %v2181_v14 = vadd.f32 %v6513_v62, %v5140_v17  ;;  %v2176_v5 = vadd.f32 %v6513_v62, %v2175_v38 }
 0x200   : > { %v6615_v2 = vpop.f32.mrf.mxu0  ;;  %4748 = vmatpush3.msra.mxu1 %v2840_v63 }
 0x201   : > { %3291 = vmatmul.mubr.f32.vlgmr.msra.gmra.mxu1 %v3006_v31  ;;  %v6644_v31 = vpop.f32.mrf.mxu1  ;;  %v2887_v24 = vmax.f32 %v2181_v14, 0.0  ;;  %v2886_v38 = vmax.f32 %v2176_v5, 0.0  ;;  %v2885_v14 = vmax.f32 %v2171_v22, 0.0  ;;  %v2151_v22 = vadd.f32 %v6513_v62, %v6573_v1 }
 0x202   : > { %v6619_v55 = vpop.f32.mrf.mxu0  ;;  %3360 = vmatprep.mubr.f32.mxu1 %v3009_v60 }
 0x203   : > { %v6653_v28 = vpop.f32.mrf.mxu1  ;;  %v2881_v52 = vmax.f32 %v2151_v22, 0.0 }
 0x204   : > { %v6621_v46 = vpop.f32.mrf.mxu0  ;;  %7147 = vst [vmem:[#allocation16_spill] sm:$0xff] %v6653_v28 }
 0x206   : > { %v6625_v37 = vpop.f32.mrf.mxu0 }
 0x208   : > { %v6627_v13 = vpop.f32.mrf.mxu0 }
 0x20a   : > { %v6631_v4 = vpop.f32.mrf.mxu0 }
 0x20c   : > { %v5152_v11 = vpop.f32.mrf.mxu0 }
 0x20e   : > { %v6635_v10 = vpop.f32.mrf.mxu0 }
 0x210   : > { %v5155_v21 = vpop.f32.mrf.mxu0 }
 0x212   : > { %v2225_v58 = vpop.f32.mrf.mxu0 }
 0x214   : > { %v5158_v45 = vpop.f32.mrf.mxu0 }
 0x216   : > { %v2235_v61 = vpop.f32.mrf.mxu0 }
 0x218   : > { %v5161_v51 = vpop.f32.mrf.mxu0 }
 0x219   : > { %v2251_v41 = vadd.f32 %v6513_v62, %v5161_v51  ;;  %v2241_v51 = vadd.f32 %v6513_v62, %v5158_v45 }
 0x21a   : > { %v2245_v40 = vpop.f32.mrf.mxu0 }
 0x21b   : > { %v2246_v17 = vadd.f32 %v6513_v62, %v2245_v40  ;;  %v6664_v40 = vpop.f32.mrf.mxu1 }
 0x21c   : > { %v5164_v63 = vpop.f32.mrf.mxu0  ;;  %7148 = vst [vmem:[#allocation17_spill] sm:$0xff] %v6664_v40 }
 0x21d   : > { %v2261_v60 = vadd.f32 %v6513_v62, %v5164_v63  ;;  %v2166_v63 = vadd.f32 %v6513_v62, %v2165_v32 }
 0x21e   : > { %v2255_v47 = vpop.f32.mrf.mxu0 }
 0x21f   : > { %v2903_v48 = vmax.f32 %v2261_v60, 0.0  ;;  %v2256_v9 = vadd.f32 %v6513_v62, %v2255_v47  ;;  %v2901_v47 = vmax.f32 %v2251_v41, 0.0  ;;  %v2884_v5 = vmax.f32 %v2166_v63, 0.0 }
 0x220   : > { %v6651_v29 = vpop.f32.mrf.mxu0  ;;  %v2231_v41 = vadd.f32 %v6513_v62, %v5155_v21  ;;  %v2146_v63 = vadd.f32 %v6513_v62, %v6581_v49  ;;  %v2216_v49 = vadd.f32 %v6513_v62, %v6635_v10 }
 0x221   : > { %v2902_v26 = vmax.f32 %v2256_v9, 0.0  ;;  %4752 = vmatprep.subr.mxu1 %v2903_v48  ;;  %v2236_v9 = vadd.f32 %v6513_v62, %v2235_v61  ;;  %v2900_v48 = vmax.f32 %v2246_v17, 0.0  ;;  %v6676_v61 = vpop.f32.mrf.mxu1  ;;  %v2226_v17 = vadd.f32 %v6513_v62, %v2225_v58 }
 0x222   : > { %v6657_v56 = vpop.f32.mrf.mxu0  ;;  %4753 = vmatpush3.msra.mxu1 %v2887_v24  ;;  %v2156_v24 = vadd.f32 %v6513_v62, %v6595_v53  ;;  %7149 = vst [vmem:[#allocation18_spill] sm:$0xff] %v6676_v61  ;;  %v2897_v1 = vmax.f32 %v2231_v41, 0.0  ;;  %v2131_v41 = vadd.f32 %v6513_v62, %v6546_v19  ;;  %v2201_v19 = vadd.f32 %v6513_v62, %v6621_v46 }
 0x223   : > { %4754 = vmatprep.subr.mxu1 %v2902_v26  ;;  %v2899_v26 = vmax.f32 %v2241_v51, 0.0  ;;  %v2898_v53 = vmax.f32 %v2236_v9, 0.0  ;;  %v2221_v51 = vadd.f32 %v6513_v62, %v5152_v11  ;;  %v6688_v58 = vpop.f32.mrf.mxu1  ;;  %v2896_v9 = vmax.f32 %v2226_v17, 0.0 }
 0x224   : > { %v6662_v60 = vpop.f32.mrf.mxu0  ;;  %4755 = vmatpush3.msra.mxu1 %v2886_v38  ;;  %v2882_v38 = vmax.f32 %v2156_v24, 0.0  ;;  %7150 = vst [vmem:[#allocation19_spill] sm:$0xff] %v6688_v58  ;;  %v2880_v11 = vmax.f32 %v2146_v63, 0.0  ;;  %v2126_v17 = vadd.f32 %v6513_v62, %v6553_v16  ;;  %v2196_v16 = vadd.f32 %v6513_v62, %v6625_v37 }
 0x225   : > { %4756 = vmatprep.subr.mxu1 %v2901_v47  ;;  %v2141_v47 = vadd.f32 %v6513_v62, %v6559_v7  ;;  %v2211_v7 = vadd.f32 %v6513_v62, %v6627_v13  ;;  %v6702_v10 = vpop.f32.mrf.mxu1 }
 0x226   : > { %v6669_v32 = vpop.f32.mrf.mxu0  ;;  %4757 = vmatpush3.msra.mxu1 %v2885_v14  ;;  %7151 = vst [vmem:[#allocation20_spill] sm:$0xff] %v6702_v10  ;;  %v2876_v46 = vmax.f32 %v2126_v17, 0.0 }
 0x227   : > { %4758 = vmatprep.subr.mxu1 %v2900_v48  ;;  %v2136_v48 = vadd.f32 %v6513_v62, %v6567_v23  ;;  %v2206_v23 = vadd.f32 %v6513_v62, %v6631_v4  ;;  %v2893_v63 = vmax.f32 %v2211_v7, 0.0  ;;  %v6716_v4 = vpop.f32.mrf.mxu1 }
 0x228   : > { %v6674_v45 = vpop.f32.mrf.mxu0  ;;  %4759 = vmatpush3.msra.mxu1 %v2884_v5  ;;  %v2895_v5 = vmax.f32 %v2221_v51, 0.0  ;;  %v2877_v51 = vmax.f32 %v2131_v41, 0.0  ;;  %7152 = vst [vmem:[#allocation21_spill] sm:$0xff] %v6716_v4  ;;  %v2106_v41 = vadd.f32 %v6513_v62, %v6529_v33  ;;  %v3011_v33 = vld [vmem:[%s7122_s1 + $0x58] sm:$0xff] }
 0x229   : > { %4760 = vmatprep.subr.mxu1 %v2899_v26  ;;  %v2879_v26 = vmax.f32 %v2141_v47, 0.0  ;;  %v2878_v13 = vmax.f32 %v2136_v48, 0.0  ;;  %v2892_v47 = vmax.f32 %v2206_v23, 0.0  ;;  %v2111_v48 = vadd.f32 %v6513_v62, %v6523_v0  ;;  %v6728_v37 = vpop.f32.mrf.mxu1 }
 0x22a   : > { %v6681_v21 = vpop.f32.mrf.mxu0  ;;  %4761 = vmatpush3.msra.mxu1 %v2883_v6  ;;  %v2894_v6 = vmax.f32 %v2216_v49, 0.0  ;;  %7153 = vst [vmem:[#allocation22_spill] sm:$0xff] %v6728_v37 }
 0x22b   : > { %4762 = vmatprep.subr.mxu1 %v2898_v53  ;;  %v6734_v17 = vpop.f32.mrf.mxu1 }
 0x22c   : > { %v6686_v14 = vpop.f32.mrf.mxu0  ;;  %4763 = vmatpush3.msra.mxu1 %v2882_v38  ;;  %v2121_v38 = vadd.f32 %v6513_v62, %v6534_v35  ;;  %v2191_v35 = vadd.f32 %v6513_v62, %v6615_v2  ;;  %7154 = vst [vmem:[#allocation23_spill] sm:$0xff] %v6734_v17 }
 0x22d   : > { %4764 = vmatprep.subr.mxu1 %v2897_v1 }
 0x22e   : > { %v6694_v24 = vpop.f32.mrf.mxu0  ;;  %4765 = vmatpush3.msra.mxu1 %v2881_v52  ;;  %v2116_v52 = vadd.f32 %v6513_v62, %v6541_v42  ;;  %v2186_v42 = vadd.f32 %v6513_v62, %v6619_v55  ;;  %v2889_v23 = vmax.f32 %v2191_v35, 0.0  ;;  %v3008_v55 = vld [vmem:[%s7122_s1 + $0x40] sm:$0xff] }
 0x22f   : > { %4766 = vmatprep.subr.mxu1 %v2896_v9  ;;  %v2891_v9 = vmax.f32 %v2201_v19, 0.0  ;;  %v2872_v19 = vmax.f32 %v2106_v41, 0.0 }
 0x230   : > { %v6700_v22 = vpop.f32.mrf.mxu0  ;;  %4767 = vmatpush3.msra.mxu1 %v2880_v11  ;;  %v2875_v11 = vmax.f32 %v2121_v38, 0.0 }
 0x231   : > { %4768 = vmatprep.subr.mxu1 %v2895_v5  ;;  %v2890_v5 = vmax.f32 %v2196_v16, 0.0 }
 0x232   : > { %v6708_v53 = vpop.f32.mrf.mxu0  ;;  %4769 = vmatpush3.msra.mxu1 %v2879_v26  ;;  %v2874_v26 = vmax.f32 %v2116_v52, 0.0 }
 0x233   : > { %4770 = vmatprep.subr.mxu1 %v2894_v6  ;;  %v2873_v6 = vmax.f32 %v2111_v48, 0.0 }
 0x234   : > { %v6714_v1 = vpop.f32.mrf.mxu0  ;;  %4771 = vmatpush3.msra.mxu1 %v2878_v13  ;;  %v2888_v13 = vmax.f32 %v2186_v42, 0.0 }
 0x235   : > { %4772 = vmatprep.subr.mxu1 %v2893_v63 }
 0x236   : > { %v6722_v49 = vpop.f32.mrf.mxu0  ;;  %4773 = vmatpush3.msra.mxu1 %v2877_v51  ;;  %v6744_v51 = vpop.f32.mrf.mxu1 }
 0x237   : > { %4774 = vmatprep.subr.mxu1 %v2892_v47  ;;  %7155 = vst [vmem:[#allocation24_spill] sm:$0xff] %v6744_v51 }
 0x238   : > { %v5185_v7 = vpop.f32.mrf.mxu0  ;;  %4775 = vmatpush3.msra.mxu1 %v2876_v46  ;;  %v6750_v52 = vpop.f32.mrf.mxu1 }
 0x239   : > { %4776 = vmatprep.subr.mxu1 %v2891_v9  ;;  %7156 = vst [vmem:[#allocation25_spill] sm:$0xff] %v6750_v52 }
 0x23a   : > { %v2325_v2 = vpop.f32.mrf.mxu0  ;;  %4777 = vmatpush3.msra.mxu1 %v2875_v11  ;;  %v6756_v9 = vpop.f32.mrf.mxu1 }
 0x23b   : > { %4778 = vmatprep.subr.mxu1 %v2890_v5  ;;  %7157 = vst [vmem:[#allocation26_spill] sm:$0xff] %v6756_v9 }
 0x23c   : > { %v5188_v0 = vpop.f32.mrf.mxu0  ;;  %4779 = vmatpush3.msra.mxu1 %v2874_v26  ;;  %v6760_v42 = vpop.f32.mrf.mxu1 }
 0x23d   : > { %4780 = vmatprep.subr.mxu1 %v2889_v23  ;;  %7158 = vst [vmem:[#allocation27_spill] sm:$0xff] %v6760_v42  ;;  %v2341_v28 = vadd.f32 %v6513_v62, %v5188_v0  ;;  %v2331_v42 = vadd.f32 %v6513_v62, %v5185_v7 }
 0x23e   : > { %v2335_v63 = vpop.f32.mrf.mxu0  ;;  %4781 = vmatpush3.msra.mxu1 %v2873_v6  ;;  %v6762_v26 = vpop.f32.mrf.mxu1 }
 0x23f   : > { %4782 = vmatprep.subr.mxu1 %v2888_v13  ;;  %7159 = vst [vmem:[#allocation28_spill] sm:$0xff] %v6762_v26  ;;  %v2336_v10 = vadd.f32 %v6513_v62, %v2335_v63  ;;  %v2919_v9 = vmax.f32 %v2341_v28, 0.0 }
 0x240   : > { %v6742_v38 = vpop.f32.mrf.mxu0  ;;  %4783 = vmatpush3.msra.mxu1 %v2872_v19  ;;  %v6764_v13 = vpop.f32.mrf.mxu1 }
 0x241   : > { %3361 = vmatmul.mubr.f32.vlgmr.msra.gmra.mxu1 %v3008_v55  ;;  %7160 = vst [vmem:[#allocation29_spill] sm:$0xff] %v6764_v13 }
 0x242   : > { %v6746_v16 = vpop.f32.mrf.mxu0  ;;  %3430 = vmatprep.mubr.f32.mxu1 %v3011_v33  ;;  %v6766_v33 = vpop.f32.mrf.mxu1 }
 0x243   : > { %7161 = vst [vmem:[#allocation30_spill] sm:$0xff] %v6766_v33 }
 0x244   : > { %v6748_v47 = vpop.f32.mrf.mxu0  ;;  %v6769_v61 = vpop.f32.mrf.mxu1 }
 0x245   : > { %7162 = vst [vmem:[#allocation31_spill] sm:$0xff] %v6769_v61  ;;  %v2326_v61 = vadd.f32 %v6513_v62, %v2325_v2  ;;  %v2316_v2 = vadd.f32 %v6513_v62, %v6722_v49  ;;  %v2306_v49 = vadd.f32 %v6513_v62, %v6708_v53  ;;  %v2296_v53 = vadd.f32 %v6513_v62, %v6694_v24 }
 0x246   : > { %v6752_v46 = vpop.f32.mrf.mxu0  ;;  %v6776_v13 = vpop.f32.mrf.mxu1  ;;  %v2286_v24 = vadd.f32 %v6513_v62, %v6681_v21  ;;  %v2276_v21 = vadd.f32 %v6513_v62, %v6669_v32  ;;  %v2266_v32 = vadd.f32 %v6513_v62, %v6657_v56 }
 0x248   : > { %v6754_v35 = vpop.f32.mrf.mxu0  ;;  %v6783_v28 = vpop.f32.mrf.mxu1  ;;  %v2904_v56 = vmax.f32 %v2266_v32, 0.0 }
 0x24a   : > { %v6758_v48 = vpop.f32.mrf.mxu0 }
 0x24c   : > { %v5200_v11 = vpop.f32.mrf.mxu0 }
 0x24e   : > { %v2375_v5 = vpop.f32.mrf.mxu0 }
 0x250   : > { %v5203_v41 = vpop.f32.mrf.mxu0 }
 0x252   : > { %v2385_v23 = vpop.f32.mrf.mxu0 }
 0x254   : > { %v5206_v6 = vpop.f32.mrf.mxu0 }
 0x255   : > { %v2401_v63 = vadd.f32 %v6513_v62, %v5206_v6 }
 0x256   : > { %v2395_v19 = vpop.f32.mrf.mxu0 }
 0x257   : > { %v2396_v7 = vadd.f32 %v6513_v62, %v2395_v19 }
 0x258   : > { %v5209_v55 = vpop.f32.mrf.mxu0 }
 0x259   : > { %v2411_v37 = vadd.f32 %v6513_v62, %v5209_v55 }
 0x25a   : > { %v2405_v40 = vpop.f32.mrf.mxu0 }
 0x25b   : > { %v2406_v0 = vadd.f32 %v6513_v62, %v2405_v40  ;;  %v2933_v33 = vmax.f32 %v2411_v37, 0.0  ;;  %v2931_v37 = vmax.f32 %v2401_v63, 0.0 }
 0x25c   : > { %v5212_v58 = vpop.f32.mrf.mxu0 }
 0x25d   : > { %v2421_v4 = vadd.f32 %v6513_v62, %v5212_v58  ;;  %v2918_v58 = vmax.f32 %v2336_v10, 0.0  ;;  %v2932_v40 = vmax.f32 %v2406_v0, 0.0  ;;  %v2916_v10 = vmax.f32 %v2326_v61, 0.0 }
 0x25e   : > { %v2415_v17 = vpop.f32.mrf.mxu0  ;;  %v2914_v61 = vmax.f32 %v2316_v2, 0.0  ;;  %v2912_v0 = vmax.f32 %v2306_v49, 0.0  ;;  %v2906_v49 = vmax.f32 %v2276_v21, 0.0 }
 0x25f   : > { %v2935_v52 = vmax.f32 %v2421_v4, 0.0  ;;  %v2416_v51 = vadd.f32 %v6513_v62, %v2415_v17  ;;  %v2321_v4 = vadd.f32 %v6513_v62, %v6714_v1  ;;  %v2917_v17 = vmax.f32 %v2331_v42, 0.0 }
 0x260   : > { %v2311_v1 = vadd.f32 %v6513_v62, %v6700_v22  ;;  %v2386_v42 = vadd.f32 %v6513_v62, %v2385_v23  ;;  %v2301_v22 = vadd.f32 %v6513_v62, %v6686_v14  ;;  %v2376_v23 = vadd.f32 %v6513_v62, %v2375_v5 }
 0x261   : > { %v2934_v26 = vmax.f32 %v2416_v51, 0.0  ;;  %4787 = vmatprep.subr.mxu1 %v2935_v52  ;;  %v2391_v51 = vadd.f32 %v6513_v62, %v5203_v41  ;;  %v2915_v52 = vmax.f32 %v2321_v4, 0.0  ;;  %v2381_v41 = vadd.f32 %v6513_v62, %v5200_v11 }
 0x262   : > { %4788 = vmatpush3.msra.mxu1 %v2919_v9  ;;  %v6791_v9 = vpop.f32.mrf.mxu1  ;;  %v2913_v19 = vmax.f32 %v2311_v1, 0.0  ;;  %v2371_v11 = vadd.f32 %v6513_v62, %v6754_v35  ;;  %v2291_v14 = vadd.f32 %v6513_v62, %v6674_v45  ;;  %v2911_v63 = vmax.f32 %v2301_v22, 0.0 }
 0x263   : > { %4789 = vmatprep.subr.mxu1 %v2934_v26  ;;  %v2930_v26 = vmax.f32 %v2396_v7, 0.0  ;;  %v2929_v6 = vmax.f32 %v2391_v51, 0.0  ;;  %v2366_v5 = vadd.f32 %v6513_v62, %v6758_v48  ;;  %v2910_v7 = vmax.f32 %v2296_v53, 0.0 }
 0x264   : > { %4790 = vmatpush3.msra.mxu1 %v2918_v58  ;;  %v6799_v55 = vpop.f32.mrf.mxu1  ;;  %v2927_v58 = vmax.f32 %v2381_v41, 0.0  ;;  %v2361_v35 = vadd.f32 %v6513_v62, %v6748_v47  ;;  %v2281_v45 = vadd.f32 %v6513_v62, %v6662_v60  ;;  %v2909_v2 = vmax.f32 %v2291_v14, 0.0 }
 0x265   : > { %4791 = vmatprep.subr.mxu1 %v2933_v33  ;;  %v2928_v33 = vmax.f32 %v2386_v42, 0.0  ;;  %v2356_v48 = vadd.f32 %v6513_v62, %v6752_v46  ;;  %v2924_v51 = vmax.f32 %v2366_v5, 0.0  ;;  %v2351_v47 = vadd.f32 %v6513_v62, %v6742_v38 }
 0x266   : > { %4792 = vmatpush3.msra.mxu1 %v2917_v17  ;;  %v6808_v4 = vpop.f32.mrf.mxu1  ;;  %v2926_v17 = vmax.f32 %v2376_v23, 0.0  ;;  %v2923_v1 = vmax.f32 %v2361_v35, 0.0  ;;  %v2271_v60 = vadd.f32 %v6513_v62, %v6651_v29  ;;  %v2346_v46 = vadd.f32 %v6513_v62, %v6746_v16 }
 0x267   : > { %4793 = vmatprep.subr.mxu1 %v2932_v40  ;;  %v2925_v40 = vmax.f32 %v2371_v11, 0.0  ;;  %v2921_v38 = vmax.f32 %v2351_v47, 0.0  ;;  %v2501_v41 = vadd.f32 %v6513_v62, %v6508_v59  ;;  %v2576_v22 = vadd.f32 %v6513_v62, %v6644_v31 }
 0x268   : > { %4794 = vmatpush3.msra.mxu1 %v2916_v10  ;;  %v6818_v10 = vpop.f32.mrf.mxu1  ;;  %v2905_v29 = vmax.f32 %v2271_v60, 0.0  ;;  %v2920_v16 = vmax.f32 %v2346_v46, 0.0  ;;  %v2571_v59 = vadd.f32 %v6513_v62, %v6637_v15  ;;  %v2491_v31 = vadd.f32 %v6513_v62, %v6504_v44 }
 0x269   : > { %4795 = vmatprep.subr.mxu1 %v2931_v37  ;;  %v2908_v37 = vmax.f32 %v2286_v24, 0.0  ;;  %v2951_v53 = vmax.f32 %v2501_v41, 0.0  ;;  %v2966_v11 = vmax.f32 %v2576_v22, 0.0  ;;  %v2486_v15 = vadd.f32 %v6513_v62, %v6506_v39  ;;  %v7168_v22 = vld [vmem:[#allocation12_spill] sm:$0xff] }
 0x26a   : > { %4796 = vmatpush3.msra.mxu1 %v2915_v52  ;;  %v2907_v52 = vmax.f32 %v2281_v45, 0.0  ;;  %v6828_v42 = vpop.f32.mrf.mxu1  ;;  %v2561_v14 = vadd.f32 %v6513_v62, %v6629_v30  ;;  %v2965_v44 = vmax.f32 %v2571_v59, 0.0  ;;  %v2949_v5 = vmax.f32 %v2491_v31, 0.0  ;;  %v7169_v59 = vld [vmem:[#allocation5_spill] sm:$0xff] }
 0x26b   : > { %4797 = vmatprep.subr.mxu1 %v2930_v26  ;;  %v2922_v26 = vmax.f32 %v2356_v48, 0.0  ;;  %v2476_v39 = vadd.f32 %v6513_v62, %v6500_v57  ;;  %v2551_v30 = vadd.f32 %v6513_v62, %v6617_v3  ;;  %v2466_v57 = vadd.f32 %v6513_v62, %v6488_v27  ;;  %v7163_v27 = vld [vmem:[#allocation9_spill] sm:$0xff] }
 0x26c   : > { %4798 = vmatpush3.msra.mxu1 %v2914_v61  ;;  %v2581_v61 = vadd.f32 %v6513_v62, %v6641_v25  ;;  %v3010_v25 = vld [vmem:[%s7122_s1 + $0x50] sm:$0xff]  ;;  %v2963_v35 = vmax.f32 %v2561_v14, 0.0  ;;  %v2541_v3 = vadd.f32 %v6513_v62, %v6601_v20  ;;  %v7164_v20 = vld [vmem:[#allocation14_spill] sm:$0xff] }
 0x26d   : > { %4799 = vmatprep.subr.mxu1 %v2929_v6  ;;  %v6838_v6 = vpop.f32.mrf.mxu1  ;;  %v2946_v48 = vmax.f32 %v2476_v39, 0.0  ;;  %v2944_v60 = vmax.f32 %v2466_v57, 0.0 }
 0x26e   : > { %4800 = vmatpush3.msra.mxu1 %v2913_v19  ;;  %v2496_v19 = vadd.f32 %v6513_v62, %v6516_v54  ;;  %v2967_v23 = vmax.f32 %v2581_v61, 0.0  ;;  %v2959_v46 = vmax.f32 %v2541_v3, 0.0  ;;  %v7174_v3 = vld [vmem:[#allocation30_spill] sm:$0xff] }
 0x26f   : > { %4801 = vmatprep.subr.mxu1 %v2928_v33  ;;  %v3013_v33 = vld [vmem:[%s7122_s1 + $0x68] sm:$0xff]  ;;  %v6854_v54 = vpop.f32.mrf.mxu1 }
 0x270   : > { %4802 = vmatpush3.msra.mxu1 %v2912_v0  ;;  %v2566_v0 = vadd.f32 %v6513_v62, %v6639_v36 }
 0x271   : > { %4803 = vmatprep.subr.mxu1 %v2927_v58  ;;  %v2950_v58 = vmax.f32 %v2496_v19, 0.0  ;;  %v6864_v36 = vpop.f32.mrf.mxu1 }
 0x272   : > { %4804 = vmatpush3.msra.mxu1 %v2911_v63  ;;  %v2481_v63 = vadd.f32 %v6513_v62, %v6494_v34  ;;  %v2964_v24 = vmax.f32 %v2566_v0, 0.0  ;;  %v2471_v34 = vadd.f32 %v6513_v62, %v6482_v12  ;;  %v2461_v12 = vadd.f32 %v6513_v62, %v6466_v18  ;;  %v7165_v18 = vld [vmem:[#allocation7_spill] sm:$0xff] }
 0x273   : > { %4805 = vmatprep.subr.mxu1 %v2926_v17  ;;  %v2556_v17 = vadd.f32 %v6513_v62, %v6633_v50  ;;  %v6874_v45 = vpop.f32.mrf.mxu1  ;;  %v2546_v50 = vadd.f32 %v6513_v62, %v6623_v43  ;;  %v2536_v43 = vadd.f32 %v6513_v62, %v6607_v8 }
 0x274   : > { %4806 = vmatpush3.msra.mxu1 %v2910_v7  ;;  %v2948_v7 = vmax.f32 %v2486_v15, 0.0  ;;  %v2945_v21 = vmax.f32 %v2471_v34, 0.0  ;;  %v2943_v32 = vmax.f32 %v2461_v12, 0.0  ;;  %v7171_v15 = vld [vmem:[#allocation6_spill] sm:$0xff] }
 0x275   : > { %4807 = vmatprep.subr.mxu1 %v2925_v40  ;;  %v2947_v40 = vmax.f32 %v2481_v63, 0.0  ;;  %v2960_v47 = vmax.f32 %v2546_v50, 0.0  ;;  %v2958_v61 = vmax.f32 %v2536_v43, 0.0  ;;  %v7172_v63 = vld [vmem:[#allocation10_spill] sm:$0xff] }
 0x276   : > { %4808 = vmatpush3.msra.mxu1 %v2909_v2  ;;  %v2962_v2 = vmax.f32 %v2556_v17, 0.0 }
 0x277   : > { %4809 = vmatprep.subr.mxu1 %v2924_v51  ;;  %v2961_v51 = vmax.f32 %v2551_v30, 0.0  ;;  %v7173_v30 = vld [vmem:[#allocation11_spill] sm:$0xff] }
 0x278   : > { %4810 = vmatpush3.msra.mxu1 %v2908_v37  ;;  %v6884_v37 = vpop.f32.mrf.mxu1 }
 0x279   : > { %4811 = vmatprep.subr.mxu1 %v2923_v1  ;;  %v2456_v1 = vadd.f32 %v6513_v62, %v7163_v27  ;;  %v6919_v27 = vld [vmem:[%s7124_s3] ss:$0 sm:$0xff] }
 0x27a   : > { %4812 = vmatpush3.msra.mxu1 %v2907_v52  ;;  %v2531_v52 = vadd.f32 %v6513_v62, %v7164_v20 }
 0x27b   : > { %4813 = vmatprep.subr.mxu1 %v2922_v26  ;;  %v2451_v26 = vadd.f32 %v6513_v62, %v7165_v18  ;;  %v7176_v18 = vld [vmem:[#allocation28_spill] sm:$0xff] }
 0x27c   : > { %4814 = vmatpush3.msra.mxu1 %v2906_v49  ;;  %v5305_v49 = vpop.f32.mrf.mxu1  ;;  %v2957_v19 = vmax.f32 %v2531_v52, 0.0  ;;  %v3012_v52 = vld [vmem:[%s7122_s1 + $0x60] sm:$0xff] }
 0x27d   : > { %4815 = vmatprep.subr.mxu1 %v2921_v38  ;;  %v7166_v38 = vld [vmem:[#allocation15_spill] sm:$0xff] }
 0x27e   : > { %4816 = vmatpush3.msra.mxu1 %v2905_v29  ;;  %v2526_v8 = vadd.f32 %v6513_v62, %v7166_v38  ;;  %v7167_v29 = vld [vmem:[#allocation8_spill] sm:$0xff]  ;;  %v2725_v31 = vpop.f32.mrf.mxu1 }
 0x27f   : > { %4817 = vmatprep.subr.mxu1 %v2920_v16  ;;  %v2446_v41 = vadd.f32 %v6513_v62, %v7167_v29  ;;  %v2942_v16 = vmax.f32 %v2456_v1, 0.0  ;;  %v7175_v1 = vld [vmem:[#allocation31_spill] sm:$0xff]  ;;  %v2726_v38 = vadd.f32 %v6919_v27, %v2725_v31 }
 0x280   : > { %4818 = vmatpush3.msra.mxu1 %v2904_v56  ;;  %v2521_v56 = vadd.f32 %v6513_v62, %v7168_v22  ;;  %v7178_v22 = vld [vmem:[#allocation26_spill] sm:$0xff] }
 0x281   : > { %3431 = vmatmul.mubr.f32.vlgmr.msra.gmra.mxu1 %v3010_v25  ;;  %4822 = vmatprep.subr.mxu1 %v2967_v23  ;;  %v5215_v25 = vpop.f32.mrf.mxu0  ;;  %v2441_v23 = vadd.f32 %v6513_v62, %v7169_v59  ;;  %v2940_v14 = vmax.f32 %v2446_v41, 0.0  ;;  %v2996_v59 = vmax.f32 %v2726_v38, 0.0 }
 0x282   : > { %4823 = vmatpush3.msra.mxu1 %v2951_v53  ;;  %3500 = vmatprep.mubr.f32.mxu1 %v3013_v33  ;;  %v2941_v33 = vmax.f32 %v2451_v26, 0.0  ;;  %v7170_v53 = vld [vmem:[#allocation13_spill] sm:$0xff]  ;;  %v2955_v17 = vmax.f32 %v2521_v56, 0.0  ;;  %v2651_v26 = vadd.f32 %v6919_v27, %v7176_v18  ;;  %v2641_v56 = vadd.f32 %v6919_v27, %v7178_v22  ;;  %v7188_v18 = vld [vmem:[#allocation16_spill] sm:$0xff] }
 0x283   : > { %4824 = vmatprep.subr.mxu1 %v2966_v11  ;;  %v2516_v0 = vadd.f32 %v6513_v62, %v7170_v53  ;;  %v2956_v11 = vmax.f32 %v2526_v8, 0.0  ;;  %v2939_v39 = vmax.f32 %v2441_v23, 0.0  ;;  %v7179_v23 = vld [vmem:[#allocation27_spill] sm:$0xff]  ;;  %v3014_v22 = vld [vmem:[%s7122_s1 + $0x70] sm:$0xff] }
 0x284   : > { %4825 = vmatpush3.msra.mxu1 %v2950_v58  ;;  %v2436_v58 = vadd.f32 %v6513_v62, %v7171_v15  ;;  %v2979_v15 = vmax.f32 %v2641_v56, 0.0  ;;  %v3576_v56 = vld [vmem:[%s7125_s4] sm:$0xff] }
 0x285   : > { %4826 = vmatprep.subr.mxu1 %v2965_v44  ;;  %v2431_v44 = vadd.f32 %v6513_v62, %v5215_v25  ;;  %v2954_v34 = vmax.f32 %v2516_v0, 0.0  ;;  %v2716_v25 = vadd.f32 %v6919_v27, %v6884_v37  ;;  %v7180_v0 = vld [vmem:[#allocation24_spill] sm:$0xff]  ;;  %v2706_v37 = vadd.f32 %v6919_v27, %v6864_v36 }
 0x286   : > { %4827 = vmatpush3.msra.mxu1 %v2949_v5  ;;  %v2511_v5 = vadd.f32 %v6513_v62, %v7172_v63  ;;  %v2938_v50 = vmax.f32 %v2436_v58, 0.0  ;;  %v2696_v36 = vadd.f32 %v6919_v27, %v6838_v6  ;;  %v2686_v6 = vadd.f32 %v6919_v27, %v6818_v10 }
 0x287   : > { %4828 = vmatprep.subr.mxu1 %v2964_v24  ;;  %v2425_v24 = vpop.f32.mrf.mxu0  ;;  %v2994_v58 = vmax.f32 %v2716_v25, 0.0  ;;  %v2676_v10 = vadd.f32 %v6919_v27, %v6799_v55  ;;  %v2666_v55 = vadd.f32 %v6919_v27, %v6783_v28  ;;  %v5475_v28 = vmov 0.0  }
 0x288   : > { %4829 = vmatpush3.msra.mxu1 %v2948_v7  ;;  %v5308_v7 = vpop.f32.mrf.mxu1  ;;  %v2426_v57 = vadd.f32 %v6513_v62, %v2425_v24 }
 0x289   : > { %4830 = vmatprep.subr.mxu1 %v2963_v35  ;;  %v2506_v35 = vadd.f32 %v6513_v62, %v7173_v30  ;;  %v7183_v30 = vld [vmem:[#allocation23_spill] sm:$0xff]  ;;  %v2986_v38 = vmax.f32 %v2676_v10, 0.0 }
 0x28a   : > { %4831 = vmatpush3.msra.mxu1 %v2947_v40  ;;  %v2741_v40 = vadd.f32 %v6513_v62, %v5308_v7  ;;  %v2735_v12 = vpop.f32.mrf.mxu1  ;;  %v2936_v20 = vmax.f32 %v2426_v57, 0.0  ;;  %v2992_v7 = vmax.f32 %v2706_v37, 0.0 }
 0x28b   : > { %4832 = vmatprep.subr.mxu1 %v2962_v2  ;;  %v2937_v2 = vmax.f32 %v2431_v44, 0.0 }
 0x28c   : > { %4833 = vmatpush3.msra.mxu1 %v2946_v48  ;;  %v2953_v48 = vmax.f32 %v2511_v5, 0.0  ;;  %v2999_v43 = vmax.f32 %v2741_v40, 0.0 }
 0x28d   : > { %4834 = vmatprep.subr.mxu1 %v2961_v51  ;;  %v2661_v51 = vadd.f32 %v6513_v62, %v7174_v3  ;;  %v7185_v3 = vld [vmem:[#allocation21_spill] sm:$0xff] }
 0x28e   : > { %4835 = vmatpush3.msra.mxu1 %v2945_v21  ;;  %v2952_v21 = vmax.f32 %v2506_v35, 0.0  ;;  %v2616_v35 = vadd.f32 %v6919_v27, %v7183_v30 }
 0x28f   : > { %4836 = vmatprep.subr.mxu1 %v2960_v47  ;;  %v2736_v47 = vadd.f32 %v6513_v62, %v2735_v12  ;;  %v3015_v62 = vld [vmem:[%s7122_s1 + $0x78] sm:$0xff] }
 0x290   : > { %4837 = vmatpush3.msra.mxu1 %v2944_v60  ;;  %v2656_v60 = vadd.f32 %v6919_v27, %v7175_v1  ;;  %v2974_v12 = vmax.f32 %v2616_v35, 0.0 }
 0x291   : > { %4838 = vmatprep.subr.mxu1 %v2959_v46  ;;  %v2731_v46 = vadd.f32 %v6919_v27, %v5305_v49  ;;  %v2998_v8 = vmax.f32 %v2736_v47, 0.0  ;;  %v2721_v49 = vadd.f32 %v6919_v27, %v6874_v45  ;;  %v2711_v45 = vadd.f32 %v6919_v27, %v6854_v54 }
 0x292   : > { %4839 = vmatpush3.msra.mxu1 %v2943_v32  ;;  %v2983_v32 = vmax.f32 %v2661_v51, 0.0  ;;  %v2982_v41 = vmax.f32 %v2656_v60, 0.0  ;;  %v2701_v54 = vadd.f32 %v6919_v27, %v6828_v42  ;;  %v2691_v42 = vadd.f32 %v6919_v27, %v6808_v4 }
 0x293   : > { %4840 = vmatprep.subr.mxu1 %v2958_v61  ;;  %v7177_v61 = vld [vmem:[#allocation29_spill] sm:$0xff]  ;;  %v2995_v53 = vmax.f32 %v2721_v49, 0.0  ;;  %v2993_v5 = vmax.f32 %v2711_v45, 0.0  ;;  %v2606_v51 = vadd.f32 %v6919_v27, %v7185_v3  ;;  %v2681_v4 = vadd.f32 %v6919_v27, %v6791_v9  ;;  %v3670_v3 = vld [vmem:[%s7127_s6 + $0x28] sm:$0xff] }
 0x294   : > { %4841 = vmatpush3.msra.mxu1 %v2942_v16  ;;  %v2646_v29 = vadd.f32 %v6919_v27, %v7177_v61  ;;  %v2997_v16 = vmax.f32 %v2731_v46, 0.0  ;;  %v2991_v40 = vmax.f32 %v2701_v54, 0.0  ;;  %v2988_v60 = vmax.f32 %v2686_v6, 0.0  ;;  %v3672_v6 = vld [vmem:[%s7127_s6 + $0x38] sm:$0xff] }
 0x295   : > { %4842 = vmatprep.subr.mxu1 %v2957_v19  ;;  %v2981_v19 = vmax.f32 %v2651_v26, 0.0  ;;  %v2972_v46 = vmax.f32 %v2606_v51, 0.0  ;;  %v2671_v9 = vadd.f32 %v6919_v27, %v6776_v13  ;;  %v2591_v26 = vadd.f32 %v6919_v27, %v7188_v18  ;;  %v3669_v51 = vld [vmem:[%s7127_s6 + $0x20] sm:$0xff] }
 0x296   : > { %4843 = vmatpush3.msra.mxu1 %v2941_v33  ;;  %v2636_v33 = vadd.f32 %v6919_v27, %v7179_v23  ;;  %v2980_v31 = vmax.f32 %v2646_v29, 0.0  ;;  %v2984_v49 = vmax.f32 %v2666_v55, 0.0  ;;  %v3665_v18 = vld [vmem:[%s7127_s6] sm:$0xff]  ;;  %v3674_v55 = vld [vmem:[%s7127_s6 + $0x48] sm:$0xff] }
 0x297   : > { %4844 = vmatprep.subr.mxu1 %v2956_v11  ;;  %v2631_v11 = vadd.f32 %v6919_v27, %v7180_v0  ;;  %v2969_v13 = vmax.f32 %v2591_v26, 0.0  ;;  %v3676_v26 = vld [vmem:[%s7127_s6 + $0x58] sm:$0xff] }
 0x298   : > { %4845 = vmatpush3.msra.mxu1 %v2940_v14  ;;  %v7181_v14 = vld [vmem:[#allocation25_spill] sm:$0xff]  ;;  %v2978_v63 = vmax.f32 %v2636_v33, 0.0 }
 0x299   : > { %4846 = vmatprep.subr.mxu1 %v2955_v17  ;;  %v2626_v44 = vadd.f32 %v6919_v27, %v7181_v14  ;;  %v7182_v17 = vld [vmem:[#allocation22_spill] sm:$0xff] }
 0x29a   : > { %4847 = vmatpush3.msra.mxu1 %v2939_v39  ;;  %v2621_v24 = vadd.f32 %v6919_v27, %v7182_v17  ;;  %v2977_v39 = vmax.f32 %v2631_v11, 0.0 }
 0x29b   : > { %4848 = vmatprep.subr.mxu1 %v2954_v34  ;;  %v2976_v34 = vmax.f32 %v2626_v44, 0.0 }
 0x29c   : > { %4849 = vmatpush3.msra.mxu1 %v2938_v50  ;;  %v7184_v50 = vld [vmem:[#allocation20_spill] sm:$0xff]  ;;  %v2975_v57 = vmax.f32 %v2621_v24, 0.0 }
 0x29d   : > { %4850 = vmatprep.subr.mxu1 %v2953_v48  ;;  %v2990_v48 = vmax.f32 %v2696_v36, 0.0 }
 0x29e   : > { %4851 = vmatpush3.msra.mxu1 %v2937_v2  ;;  %v2611_v2 = vadd.f32 %v6919_v27, %v7184_v50 }
 0x29f   : > { %4852 = vmatprep.subr.mxu1 %v2952_v21  ;;  %v2989_v21 = vmax.f32 %v2691_v42, 0.0 }
 0x2a0   : > { %4853 = vmatpush3.msra.mxu1 %v2936_v20  ;;  %v2973_v1 = vmax.f32 %v2611_v2, 0.0  ;;  %v7187_v20 = vld [vmem:[#allocation19_spill] sm:$0xff] }
 0x2a1   : > { %3501 = vmatmul.mubr.f32.vlgmr.msra.gmra.mxu1 %v3012_v52  ;;  %4857 = vmatprep.subr.mxu1 %v2999_v43  ;;  %v7186_v43 = vld [vmem:[#allocation18_spill] sm:$0xff]  ;;  %v2596_v52 = vadd.f32 %v6919_v27, %v7187_v20 }
 0x2a2   : > { %4858 = vmatpush3.msra.mxu1 %v2983_v32  ;;  %3570 = vmatprep.mubr.f32.mxu1 %v3015_v62  ;;  %v2601_v47 = vadd.f32 %v6919_v27, %v7186_v43  ;;  %v2987_v62 = vmax.f32 %v2681_v4, 0.0 }
 0x2a3   : > { %4859 = vmatprep.subr.mxu1 %v2998_v8  ;;  %v7189_v8 = vld [vmem:[#allocation17_spill] sm:$0xff]  ;;  %v2970_v29 = vmax.f32 %v2596_v52, 0.0  ;;  %v3668_v52 = vld [vmem:[%s7127_s6 + $0x18] sm:$0xff] }
 0x2a4   : > { %4860 = vmatpush3.msra.mxu1 %v2982_v41  ;;  %v2971_v32 = vmax.f32 %v2601_v47, 0.0  ;;  %v2586_v61 = vadd.f32 %v6919_v27, %v7189_v8  ;;  %v2985_v41 = vmax.f32 %v2671_v9, 0.0  ;;  %v3577_v27 = vld [vmem:[%s7125_s4 + $0x8] sm:$0xff]  ;;  %v3667_v9 = vld [vmem:[%s7127_s6 + $0x10] sm:$0xff] }
 0x2a5   : > { %4861 = vmatprep.subr.mxu1 %v2997_v16 }
 0x2a6   : > { %4862 = vmatpush3.msra.mxu1 %v2981_v19  ;;  %v2968_v16 = vmax.f32 %v2586_v61, 0.0  ;;  %v4644_v19 = vpop.f32.mrf.mxu1  ;;  %v3673_v61 = vld [vmem:[%s7127_s6 + $0x40] sm:$0xff] }
 0x2a7   : > { %4863 = vmatprep.subr.mxu1 %v2996_v59 }
 0x2a8   : > { %4864 = vmatpush3.msra.mxu1 %v2980_v31  ;;  %v4645_v25 = vpop.f32.mrf.mxu1 }
 0x2a9   : > { %4865 = vmatprep.subr.mxu1 %v2995_v53  ;;  %v4646_v37 = vadd.f32 %v4645_v25, %v4644_v19 }
 0x2aa   : > { %4866 = vmatpush3.msra.mxu1 %v2979_v15  ;;  %v4679_v59 = vpop.f32.mrf.mxu1 }
 0x2ab   : > { %4867 = vmatprep.subr.mxu1 %v2994_v58 }
 0x2ac   : > { %4868 = vmatpush3.msra.mxu1 %v2978_v63  ;;  %v4680_v23 = vpop.f32.mrf.mxu1 }
 0x2ad   : > { %4869 = vmatprep.subr.mxu1 %v2993_v5  ;;  %v4681_v58 = vadd.f32 %v4680_v23, %v4679_v59  ;;  %v4343_v23 = vld [vmem:[%s7128_s7] ss:$0 sm:$0xff] }
 0x2ae   : > { %4870 = vmatpush3.msra.mxu1 %v2977_v39  ;;  %v4714_v33 = vpop.f32.mrf.mxu1 }
 0x2af   : > { %4871 = vmatprep.subr.mxu1 %v2992_v7  ;;  %v3153_v44 = vadd.f32 %v4681_v58, %v4646_v37 }
 0x2b0   : > { %4872 = vmatpush3.msra.mxu1 %v2976_v34  ;;  %v4715_v31 = vpop.f32.mrf.mxu1 }
 0x2b1   : > { %4873 = vmatprep.subr.mxu1 %v2991_v40  ;;  %v4716_v63 = vadd.f32 %v4715_v31, %v4714_v33 }
 0x2b2   : > { %4874 = vmatpush3.msra.mxu1 %v2975_v57 }
 0x2b3   : > { %4875 = vmatprep.subr.mxu1 %v2990_v48  ;;  %v3223_v17 = vadd.f32 %v4716_v63, %v3153_v44  ;;  %v3671_v48 = vld [vmem:[%s7127_s6 + $0x30] sm:$0xff] }
 0x2b4   : > { %4876 = vmatpush3.msra.mxu1 %v2974_v12  ;;  %v4338_v12 = vld [vmem:[%s7126_s5] ss:$0 sm:$0xff] }
 0x2b5   : > { %4877 = vmatprep.subr.mxu1 %v2989_v21 }
 0x2b6   : > { %4878 = vmatpush3.msra.mxu1 %v2973_v1 }
 0x2b7   : > { %4879 = vmatprep.subr.mxu1 %v2988_v60 }
 0x2b8   : > { %4880 = vmatpush3.msra.mxu1 %v2972_v46 }
 0x2b9   : > { %4881 = vmatprep.subr.mxu1 %v2987_v62  ;;  %v3666_v62 = vld [vmem:[%s7127_s6 + $0x8] sm:$0xff] }
 0x2ba   : > { %4882 = vmatpush3.msra.mxu1 %v2971_v32  ;;  %v3675_v32 = vld [vmem:[%s7127_s6 + $0x50] sm:$0xff] }
 0x2bb   : > { %4883 = vmatprep.subr.mxu1 %v2986_v38 }
 0x2bc   : > { %4884 = vmatpush3.msra.mxu1 %v2970_v29 }
 0x2bd   : > { %4885 = vmatprep.subr.mxu1 %v2985_v41  ;;  %v3917_v41 = vld [vmem:[%s7129_s8 + $0x18] sm:$0xff] }
 0x2be   : > { %4886 = vmatpush3.msra.mxu1 %v2969_v13  ;;  %v3916_v13 = vld [vmem:[%s7129_s8 + $0x10] sm:$0xff] }
 0x2bf   : > { %4887 = vmatprep.subr.mxu1 %v2984_v49  ;;  %v3915_v49 = vld [vmem:[%s7129_s8 + $0x8] sm:$0xff] }
 0x2c0   : > { %4888 = vmatpush3.msra.mxu1 %v2968_v16  ;;  %v3914_v16 = vld [vmem:[%s7129_s8] sm:$0xff] }
 0x2c1   : > { %3571 = vmatmul.mubr.f32.vlgmr.msra.gmra.mxu1 %v3014_v22  ;;  %5309 = vmatprep.subr.mxu1 %v5475_v28  ;;  %v4749_v45 = vpop.f32.mrf.mxu1 }
 0x2c2   : > { %5310 = vmatpush3.msra.mxu1 %v3577_v27  ;;  %5313 = vmatprep.mubr.msk.f32.mxu1 %vm5476_vm2, %v5475_v28 }
 0x2c3   : > { %5311 = vmatprep.subr.mxu1 %v5475_v28  ;;  %v4750_v53 = vpop.f32.mrf.mxu1 }
 0x2c4   : > { %5312 = vmatpush3.msra.mxu1 %v3576_v56  ;;  %v4751_v5 = vadd.f32 %v4750_v53, %v4749_v45  ;;  %v4344_v53 = vld [vmem:[%s7130_s9] ss:$0 sm:$0xff] }
 0x2c5   : > { %5316 = vmatprep.subr.mxu1 %v5475_v28 }
 0x2c6   : > { %v3293_v36 = vadd.f32 %v4751_v5, %v3223_v17 }
 0x301   : > { %v4784_v0 = vpop.f32.mrf.mxu1 }
 0x303   : > { %v4785_v11 = vpop.f32.mrf.mxu1 }
 0x304   : > { %v4786_v24 = vadd.f32 %v4785_v11, %v4784_v0 }
 0x306   : > { %v3363_v30 = vadd.f32 %v4786_v24, %v3293_v36 }
 0x341   : > { %v4819_v15 = vpop.f32.mrf.mxu1 }
 0x343   : > { %v4820_v14 = vpop.f32.mrf.mxu1 }
 0x344   : > { %v4821_v7 = vadd.f32 %v4820_v14, %v4819_v15 }
 0x346   : > { %v3433_v42 = vadd.f32 %v4821_v7, %v3363_v30 }
 0x361   : > { %v4854_v54 = vpop.f32.mrf.mxu1 }
 0x363   : > { %v4855_v39 = vpop.f32.mrf.mxu1 }
 0x364   : > { %v4856_v35 = vadd.f32 %v4855_v39, %v4854_v54 }
 0x366   : > { %v3503_v50 = vadd.f32 %v4856_v35, %v3433_v42 }
 0x381   : > { %v4889_v34 = vpop.f32.mrf.mxu1 }
 0x383   : > { %v4890_v40 = vpop.f32.mrf.mxu1 }
 0x384   : > { %v4891_v2 = vadd.f32 %v4890_v40, %v4889_v34 }
 0x386   : > { %v3573_v57 = vadd.f32 %v4891_v2, %v3503_v50 }
 0x388   : > { %5314 = vmatmul.mubr.msk.f32.vlgmr.msra.gmra.mxu1 %vm3585_vm3, %v3573_v57 }
 0x389   : > { %5324 = vmatprep.mubr.msk.f32.mxu1 %vm5476_vm2, %v5475_v28  ;;  %5317 = vmatpush3.msra.mxu1 %v3672_v6 }
 0x38a   : > { %5318 = vmatprep.subr.mxu1 %v5475_v28 }
 0x38b   : > { %5319 = vmatpush3.msra.mxu1 %v3671_v48 }
 0x38c   : > { %5320 = vmatprep.subr.mxu1 %v5475_v28 }
 0x38d   : > { %5321 = vmatpush3.msra.mxu1 %v3670_v3 }
 0x38e   : > { %5322 = vmatprep.subr.mxu1 %v5475_v28 }
 0x38f   : > { %5323 = vmatpush3.msra.mxu1 %v3669_v51 }
 0x390   : > { %5327 = vmatprep.subr.mxu1 %v5475_v28 }
 0x448   : > { %v3655_v4 = vpop.f32.mrf.mxu1 }
 0x449   : > { %v3656_v21 = vadd.f32 %v4338_v12, %v3655_v4 }
 0x44a   : > { %v5315_v43 = vpop.f32.mrf.mxu1 }
 0x44b   : > { %v3660_v47 = vrot.slane %v3656_v21, 7 }
 0x44d   : > { %v3663_v1 = vsel %vm3662_vm4, 0.0, %v3660_v47  ;;  %v3664_v10 = vsel %vm3662_vm4, %v3660_v47, 0.0 }
 0x44e   : > { %v3680_v60 = vrot.slane %v3663_v1, 1  ;;  %v3681_v20 = vrot.slane %v3664_v10, 1  ;;  %v3829_v38 = vrot.slane %v3663_v1, 2  ;;  %v3830_v8 = vrot.slane %v3664_v10, 2 }
 0x450   : > { %v3682_v46 = vsel %vm3679_vm5, %v3680_v60, %v3681_v20  ;;  %v3831_v29 = vsel %vm3828_vm7, %v3829_v38, %v3830_v8 }
 0x451   : > { %5325 = vmatmul.mubr.msk.f32.vlgmr.msra.gmra.mxu1 %vm3683_vm6, %v3682_v46 }
 0x452   : > { %5328 = vmatpush3.msra.mxu1 %v3668_v52  ;;  %5335 = vmatprep.mubr.msk.f32.mxu1 %vm5476_vm2, %v5475_v28 }
 0x453   : > { %5329 = vmatprep.subr.mxu1 %v5475_v28 }
 0x454   : > { %5330 = vmatpush3.msra.mxu1 %v3667_v9 }
 0x455   : > { %5331 = vmatprep.subr.mxu1 %v5475_v28 }
 0x456   : > { %5332 = vmatpush3.msra.mxu1 %v3666_v62 }
 0x457   : > { %5333 = vmatprep.subr.mxu1 %v5475_v28 }
 0x458   : > { %5334 = vmatpush3.msra.mxu1 %v3665_v18 }
 0x459   : > { %5336 = vmatmul.mubr.msk.f32.vlgmr.msra.gmra.mxu1 %vm3683_vm6, %v3663_v1  ;;  %5338 = vmatprep.subr.mxu1 %v5475_v28 }
 0x45a   : > { %5339 = vmatpush3.msra.mxu1 %v3676_v26  ;;  %5346 = vmatprep.mubr.msk.f32.mxu1 %vm5476_vm2, %v5475_v28 }
 0x45b   : > { %5340 = vmatprep.subr.mxu1 %v5475_v28 }
 0x45c   : > { %5341 = vmatpush3.msra.mxu1 %v3675_v32 }
 0x45d   : > { %5342 = vmatprep.subr.mxu1 %v5475_v28 }
 0x45e   : > { %5343 = vmatpush3.msra.mxu1 %v3674_v55 }
 0x45f   : > { %5344 = vmatprep.subr.mxu1 %v5475_v28 }
 0x460   : > { %5345 = vmatpush3.msra.mxu1 %v3673_v61 }
 0x461   : > { %5347 = vmatmul.mubr.msk.f32.vlgmr.msra.gmra.mxu1 %vm3683_vm6, %v3831_v29  ;;  %5349 = vmatprep.subr.mxu1 %v5475_v28 }
 0x462   : > { %5357 = vmatprep.mubr.msk.f32.mxu1 %vm5476_vm2, %v5475_v28  ;;  %5350 = vmatpush3.msra.mxu1 %v3917_v41 }
 0x463   : > { %5351 = vmatprep.subr.mxu1 %v5475_v28 }
 0x464   : > { %5352 = vmatpush3.msra.mxu1 %v3916_v13 }
 0x465   : > { %5353 = vmatprep.subr.mxu1 %v5475_v28 }
 0x466   : > { %5354 = vmatpush3.msra.mxu1 %v3915_v49 }
 0x467   : > { %5355 = vmatprep.subr.mxu1 %v5475_v28 }
 0x468   : > { %5356 = vmatpush3.msra.mxu1 %v3914_v16 }
 0x511   : > { %v3752_v22 = vpop.f32.mrf.mxu1 }
 0x513   : > { %v5326_v27 = vpop.f32.mrf.mxu1 }
 0x519   : > { %v3824_v56 = vpop.f32.mrf.mxu1 }
 0x51a   : > { %v3825_v25 = vadd.f32 %v3824_v56, %v3752_v22 }
 0x51b   : > { %v5337_v19 = vpop.f32.mrf.mxu1 }
 0x521   : > { %v3900_v59 = vpop.f32.mrf.mxu1 }
 0x522   : > { %v3904_v33 = vadd.f32 %v3900_v59, %v3825_v25 }
 0x523   : > { %v5348_v31 = vpop.f32.mrf.mxu1 }
 0x524   : > { %v3912_v45 = vadd.f32 %v4343_v23, %v3904_v33 }
 0x526   : > { %v3913_v28 = vmax.f32 %v3912_v45, 0.0 }
 0x528   : > { %5358 = vmatmul.mubr.msk.f32.vlgmr.msra.gmra.mxu1 %vm3683_vm6, %v3913_v28 }
 0x5e8   : > { %v3994_v0 = vpop.f32.mrf.mxu1 }
 0x5e9   : > { %v3995_v11 = vadd.f32 %v4344_v53, %v3994_v0 }
 0x5ea   : > { %v5359_v15 = vpop.f32.mrf.mxu1 }
 0x5eb   : > { %3999 = vst.msk [vmem:[%s352_s21] sm:$0xff] %vm3998_vm8, %v3995_v11 }
 0x5ec   : > { %5426 = shalt.err (!%p5423_p3)
}
 0x5ed   : > { %s5427_s18 = scalar_lea.hbm %s7086_s29, 128  ;;  %s5431_s21 = scalar_lea.hbm %s7131_s10, 256 }
 0x5ee   : > { %p5428_p4 = scmp.ne.s32.totalorder %s7086_s29, %s5427_s18  ;;  %p5432_p9 = scmp.lt.s32.totalorder %s7086_s29, %s7131_s10 }
 0x5ef   : > { %p5433_p10 = scmp.lt.s32.totalorder %s5431_s21, %s5427_s18 }
 0x5f0   : > { %p5429_p7 = pnand %p5428_p4, %p5571_p5 }
 0x5f1   : > { %p5434_p11 = por %p5433_p10, %p5432_p9 }
 0x5f2   : > { %p5430_p8 = pneg %p5429_p7 }
 0x5f4   : > { %p5435_p12 = pnand %p5434_p11, %p5430_p8 }
 0x5f6   : > { %5438 = shalt.err (!%p5435_p12)
}
 0x5f7   : > { %5370 = dma.vmem_to_hbm [thread:$0]  (%p5571_p5), %s4015_s25, 128, %s7086_s29, %s4001_s30  }
 0x5f8 PF: > { %p5376_p13 = scmp.ge.s32.totalorder %s5473_s16, 2  ;;  %s4026_s0 = sand.u32 1, %s5461_s13  }
 0x5f9   : > { %s4027_s17 = scalar_lea.sflag [#allocation3], %s4026_s0 }
 0x5fa   : > { %p5373_p0 = pnand %p5376_p13, %p5575_p6 }
 0x5fc   : > { %p5374_p1 = pneg %p5373_p0 }
 0x5fe   : > { %5456 = dma.done.wait (%p5374_p1), %s4027_s17, 128  }
 0x5ff   : > { %5458 = vsyncadd (%p5374_p1), %s4027_s17, 4294967168  ;;  %p20_p2 = scmp.ge.s32.totalorder %s5558_s19, 4   ;;  %s7190_s13 = smov %s5465_s14 }
 0x600   : > { %s7191_s14 = smov %s5469_s15  ;;  %s7192_s15 = smov %s5569_s22 }
 0x601   : > { %s7193_s16 = smov %s5558_s19  ;;  %22 = sbr.rel (!%p20_p2) target bundleno = 5 (0x5), region = 95 }
 0x606   :  { %4032 = vsyncpa [#allocation3], 1 }
 0x607   :  { %4034 = vsyncpa [#allocation3 + $0x1], 1 }

</bundles_post_ra>
